<compile_context>
chip_gen: v5e
topology: v5e:2x2
jax: 0.10.0
libtpu: 0.0.40
codegen_flags: <defaults>
</compile_context>

<pallas_src>
import numpy as np
import jax
import jax.numpy as jnp
from jax import lax
from jax.experimental import pallas as pl
from jax.experimental.pallas import tpu as pltpu


# ------------------------------ Pallas kernel ------------------------------ #

def biasfree_layernorm_kernel(x_ref, w_ref, o_ref):
    """x_ref: (TR, D), w_ref: (1, D), o_ref: (TR, D)."""
    x = x_ref[...].astype(jnp.float32)
    d_inv = 1.0 / x.shape[-1]
    s1 = jnp.sum(x, axis=-1, keepdims=True) * d_inv            # E[x]      (XLU)
    s2 = jnp.sum(x * x, axis=-1, keepdims=True) * d_inv        # E[x^2]    (XLU)
    var = jnp.maximum(s2 - s1 * s1, 0.0)                       # clamp cancellation
    inv = lax.rsqrt(var + 1e-5)                                 # EUP
    w = w_ref[...].astype(jnp.float32)
    o_ref[...] = ((x * inv) * w).astype(o_ref.dtype)            # VPU


# -------------------------------- wrapper ----------------------------------- #

def _sublane_multiple(dtype):
    # f32 -> 8 sublanes, bf16/f16 -> 16, int8/fp8 -> 32 (packed layouts).
    return {4: 8, 2: 16, 1: 32}.get(jnp.dtype(dtype).itemsize, 8)


def _row_tile(R, D, dtype, target_f32_bytes=6 << 20):
    """Row tile sized to ~6 MiB of f32 footprint, rounded down to the dtype's
    sublane multiple.  Clamped to R (full-extent block) for small problems."""
    sub = _sublane_multiple(dtype)
    tr = (target_f32_bytes // (D * 4)) // sub * sub
    tr = max(tr, sub)
    if tr >= R:
        return R                     # single full-extent block; still valid layout
    return tr


def biasfree_layernorm(x, weight):
    """Matches PyTorch BiasFree_LayerNorm.forward. x: (..., D), weight: (D,)."""
    orig_shape = x.shape
    D = orig_shape[-1]
    R = int(np.prod(orig_shape[:-1]))
    x2 = x.reshape(R, D)
    w2 = weight.reshape(1, D)

    TR = _row_tile(R, D, x.dtype)
    grid = (pl.cdiv(R, TR),)         # partial last block handled by Pallas

    io_bytes = jnp.dtype(x.dtype).itemsize
    cost = pl.CostEstimate(
        flops=6 * R * D,
        transcendentals=R,
        bytes_accessed=2 * R * D * io_bytes + D * jnp.dtype(weight.dtype).itemsize,
    )

    out = pl.pallas_call(
        biasfree_layernorm_kernel,
        out_shape=jax.ShapeDtypeStruct((R, D), x.dtype),
        grid=grid,
        in_specs=[
            pl.BlockSpec((TR, D), lambda i: (i, 0)),   # row tile, full D on lanes
            pl.BlockSpec((1, D), lambda i: (0, 0)),    # weight, reused every step
        ],
        out_specs=pl.BlockSpec((TR, D), lambda i: (i, 0)),
        compiler_params=pltpu.CompilerParams(
            dimension_semantics=("parallel",),         # row axis shards on megacore
            vmem_limit_bytes=48 << 20,                 # room for double-buffered blocks
        ),
        cost_estimate=cost,
    )(x2, w2)
    return out.reshape(orig_shape)


# ----------------------------- numpy reference ------------------------------ #

def ref_forward(x, weight):
    x = np.asarray(x, np.float64)
    w = np.asarray(weight, np.float64)
    var = x.var(axis=-1, keepdims=True)          # ddof=0 == unbiased=False
    return x / np.sqrt(var + 1e-5) * w


# ---------------------------------- main ------------------------------------ #

if __name__ == "__main__":
    # Restormer applies this LayerNorm over tokens of shape (B, H*W, C).
    B, HW, D = 2, 256, 128                       # e.g. 16x16 spatial, 128 channels
    key = jax.random.PRNGKey(0)
    kx, kw = jax.random.split(key)
    x = jax.random.normal(kx, (B, HW, D), jnp.float32)
    weight = 1.0 + 0.1 * jax.random.normal(kw, (D,), jnp.float32)

    fn = jax.jit(biasfree_layernorm)

    # f32 I/O
    out = jax.block_until_ready(fn(x, weight))
    assert out.shape == x.shape, (out.shape, x.shape)
    np.testing.assert_allclose(np.asarray(out), ref_forward(x, weight),
                               rtol=1e-4, atol=1e-5)

    # bf16 I/O (kernel computes in f32 internally, rounds only at the store)
    x_bf16 = x.astype(jnp.bfloat16)
    out_bf16 = jax.block_until_ready(fn(x_bf16, weight))
    assert out_bf16.dtype == jnp.bfloat16
    np.testing.assert_allclose(np.asarray(out_bf16, np.float32),
                               ref_forward(x_bf16, weight),
                               rtol=1e-2, atol=1e-2)

    print("KERNEL_OK")
</pallas_src>

<mosaic_0001>
module attributes {stable_mosaic.version = 11 : i64} {
  func.func @biasfree_layernorm_kernel(%arg0: i32, %arg1: memref<512x128xf32, #tpu.memory_space<vmem>>, %arg2: memref<1x128xf32, #tpu.memory_space<vmem>>, %arg3: memref<512x128xf32, #tpu.memory_space<vmem>>) attributes {dimension_semantics = [#tpu.dimension_semantics<parallel>], iteration_bounds = array<i64: 1>, scalar_prefetch = 0 : i64, scratch_operands = 0 : i64, tpu.core_type = #tpu.core_type<tc>, window_params = [{transform_indices = @transform_0, window_bounds = array<i64: 512, 128>}, {pipeline_mode = #tpu.pipeline_mode<synchronous>, transform_indices = @transform_1, window_bounds = array<i64: 1, 128>}, {transform_indices = @transform_2, window_bounds = array<i64: 512, 128>}]} {
    %c0 = arith.constant 0 : index
    %c0_0 = arith.constant 0 : index
    %0 = vector.load %arg1[%c0, %c0_0] : memref<512x128xf32, #tpu.memory_space<vmem>>, vector<512x128xf32>
    %cst = arith.constant dense<0.000000e+00> : vector<512xf32>
    %1 = vector.multi_reduction <add>, %0, %cst [1] : vector<512x128xf32> to vector<512xf32>
    %2 = vector.shape_cast %1 : vector<512xf32> to vector<512x1xf32>
    %cst_1 = arith.constant 7.812500e-03 : f32
    %3 = vector.broadcast %cst_1 : f32 to vector<512x1xf32>
    %4 = arith.mulf %2, %3 : vector<512x1xf32>
    %5 = arith.mulf %0, %0 : vector<512x128xf32>
    %cst_2 = arith.constant dense<0.000000e+00> : vector<512xf32>
    %6 = vector.multi_reduction <add>, %5, %cst_2 [1] : vector<512x128xf32> to vector<512xf32>
    %7 = vector.shape_cast %6 : vector<512xf32> to vector<512x1xf32>
    %cst_3 = arith.constant 7.812500e-03 : f32
    %8 = vector.broadcast %cst_3 : f32 to vector<512x1xf32>
    %9 = arith.mulf %7, %8 : vector<512x1xf32>
    %10 = arith.mulf %4, %4 : vector<512x1xf32>
    %11 = arith.subf %9, %10 : vector<512x1xf32>
    %cst_4 = arith.constant 0.000000e+00 : f32
    %12 = vector.broadcast %cst_4 : f32 to vector<512x1xf32>
    %13 = arith.maximumf %11, %12 : vector<512x1xf32>
    %cst_5 = arith.constant 9.99999974E-6 : f32
    %14 = vector.broadcast %cst_5 : f32 to vector<512x1xf32>
    %15 = arith.addf %13, %14 : vector<512x1xf32>
    %16 = math.rsqrt %15 : vector<512x1xf32>
    %c0_6 = arith.constant 0 : index
    %c0_7 = arith.constant 0 : index
    %17 = vector.load %arg2[%c0_6, %c0_7] : memref<1x128xf32, #tpu.memory_space<vmem>>, vector<1x128xf32>
    %18 = vector.broadcast %16 : vector<512x1xf32> to vector<512x128xf32>
    %19 = arith.mulf %0, %18 : vector<512x128xf32>
    %20 = vector.broadcast %17 : vector<1x128xf32> to vector<512x128xf32>
    %21 = arith.mulf %19, %20 : vector<512x128xf32>
    %c0_8 = arith.constant 0 : index
    %c0_9 = arith.constant 0 : index
    %22 = vector.load %arg3[%c0_8, %c0_9] : memref<512x128xf32, #tpu.memory_space<vmem>>, vector<512x128xf32>
    tpu.vector_store %arg3[%c0_8, %c0_9], %21 {strides = array<i32>} : memref<512x128xf32, #tpu.memory_space<vmem>>, vector<512x128xf32>,
    return
  }
  func.func @transform_0(%arg0: i32) -> (i32, i32) {
    %c0_i32 = arith.constant 0 : i32
    %c0_i32_0 = arith.constant 0 : i32
    return %arg0, %c0_i32 : i32, i32
  }
  func.func @transform_1(%arg0: i32) -> (i32, i32) {
    %c0_i32 = arith.constant 0 : i32
    %c0_i32_0 = arith.constant 0 : i32
    %c0_i32_1 = arith.constant 0 : i32
    return %c0_i32, %c0_i32_0 : i32, i32
  }
  func.func @transform_2(%arg0: i32) -> (i32, i32) {
    %c0_i32 = arith.constant 0 : i32
    %c0_i32_0 = arith.constant 0 : i32
    return %arg0, %c0_i32 : i32, i32
  }
}

</mosaic_0001>

<bundles_post_ra>
// kernel: biasfree_layernorm.1
= control target key start
LH: loop header
LB: loop body
LE: loop exit
PB: predicated region body
PF: predicated region fallthrough
CT: control target
= control target key end

     0   :  { %7 = vsyncpa [#allocation3], 0  ;;  %s3635_s0 = inlined_call_operand.hbm [shape: f32[512,128], index: 0, kind: input, shape index: {}]   ;;  %s3636_s1 = inlined_call_operand.vmem [shape: f32[1,128], index: 1, kind: input, shape index: {}]   ;;  %s3637_s2 = inlined_call_operand.hbm [shape: f32[512,128], index: 2, kind: output, shape index: {}]  }
   0x1   :  { %8 = vsyncpa [#allocation4], 0  ;;  %s13_s11 = sshll.u32 %s3635_s0, 4  ;;  %s1905_s12 = smov [#allocation2]   ;;  %s14_s11 = int_to_ptr.hbm [resolvable:$true] %s13_s11 }
   0x2   :  { %s15_s13 = sshll.u32 %s1905_s12, 4  ;;  %s1906_s14 = smov 128   ;;  %s16_s13 = int_to_ptr.vmem [resolvable:$true] %s15_s13 }
   0x3   :  { %s1907_s15 = smov 8  }
   0x4   :  { %21 = dma.hbm_to_vmem [thread:$0]  %s14_s11, 8192, %s16_s13, [#allocation3], %s1906_s14, %s1906_s14, %s1907_s15  }
   0x5   :  { %1901 = dma.done.wait [#allocation3], 8192  }
   0x6   :  { %1902 = vsyncadd [#allocation3], 4294959104  ;;  %v1930_v0 = vld [vmem:[#allocation2 + $0x20] sm:$0xff]  ;;  %v1932_v1 = vld [vmem:[#allocation2 + $0x10] sm:$0xff]  ;;  %s1638_s24 = sshll.u32 %s3637_s2, 4  ;;  %s1639_s24 = int_to_ptr.hbm [resolvable:$true] %s1638_s24 }
   0x7   :  { %v1934_v2 = vld [vmem:[#allocation2] sm:$0xff]  ;;  %100 = vadd.xlane.f32.xlu2 %v1930_v0  ;;  %96 = vadd.xlane.f32.xlu1 %v1932_v1  ;;  %v1939_v3 = vld [vmem:[#allocation2 + $0x28] sm:$0xff]  ;;  %v1941_v4 = vld [vmem:[#allocation2 + $0x18] sm:$0xff] }
   0x8   :  { %3661 = vst [vmem:[#allocation8_spill] sm:$0xff] %v1934_v2  ;;  %92 = vadd.xlane.f32.xlu0 %v1934_v2  ;;  %v1943_v5 = vld [vmem:[#allocation2 + $0x8] sm:$0xff]  ;;  %v1948_v6 = vld [vmem:[#allocation2 + $0x40] sm:$0xff]  ;;  %v1950_v7 = vld [vmem:[#allocation2 + $0x38] sm:$0xff] }
   0x9   :  { %3662 = vst [vmem:[#allocation9_spill] sm:$0xff] %v1943_v5  ;;  %v1952_v8 = vld [vmem:[#allocation2 + $0x30] sm:$0xff]  ;;  %v1957_v9 = vld [vmem:[#allocation2 + $0x58] sm:$0xff]  ;;  %v1961_v11 = vld [vmem:[#allocation2 + $0x48] sm:$0xff] }
   0xa   :  { %v1959_v10 = vld [vmem:[#allocation2 + $0x50] sm:$0xff]  ;;  %v1968_v13 = vld [vmem:[#allocation2 + $0x68] sm:$0xff]  ;;  %v1970_v14 = vld [vmem:[#allocation2 + $0x60] sm:$0xff] }
   0xb   :  { %v1966_v12 = vld [vmem:[#allocation2 + $0x70] sm:$0xff]  ;;  %v1975_v15 = vld [vmem:[#allocation2 + $0x88] sm:$0xff]  ;;  %v1977_v16 = vld [vmem:[#allocation2 + $0x80] sm:$0xff] }
   0xc   :  { %v1979_v17 = vld [vmem:[#allocation2 + $0x78] sm:$0xff]  ;;  %v1984_v18 = vld [vmem:[#allocation2 + $0xa0] sm:$0xff]  ;;  %v1988_v20 = vld [vmem:[#allocation2 + $0x90] sm:$0xff] }
   0xd   :  { %v1986_v19 = vld [vmem:[#allocation2 + $0x98] sm:$0xff]  ;;  %v1995_v22 = vld [vmem:[#allocation2 + $0xb0] sm:$0xff]  ;;  %v1997_v23 = vld [vmem:[#allocation2 + $0xa8] sm:$0xff] }
   0xe   :  { %v1993_v21 = vld [vmem:[#allocation2 + $0xb8] sm:$0xff]  ;;  %v2002_v24 = vld [vmem:[#allocation2 + $0xd0] sm:$0xff]  ;;  %v2004_v25 = vld [vmem:[#allocation2 + $0xc8] sm:$0xff] }
   0xf   :  { %102 = vadd.xlane.f32.xlu2 %v1939_v3  ;;  %98 = vadd.xlane.f32.xlu1 %v1941_v4  ;;  %v2006_v26 = vld [vmem:[#allocation2 + $0xc0] sm:$0xff]  ;;  %v2011_v27 = vld [vmem:[#allocation2 + $0xe8] sm:$0xff]  ;;  %v2015_v29 = vld [vmem:[#allocation2 + $0xd8] sm:$0xff] }
  0x10   :  { %94 = vadd.xlane.f32.xlu0 %v1943_v5  ;;  %v2013_v28 = vld [vmem:[#allocation2 + $0xe0] sm:$0xff]  ;;  %v2022_v31 = vld [vmem:[#allocation2 + $0xf8] sm:$0xff]  ;;  %v2024_v32 = vld [vmem:[#allocation2 + $0xf0] sm:$0xff] }
  0x11   :  { %v2020_v30 = vld [vmem:[#allocation2 + $0x100] sm:$0xff]  ;;  %v2029_v33 = vld [vmem:[#allocation2 + $0x118] sm:$0xff]  ;;  %v2031_v34 = vld [vmem:[#allocation2 + $0x110] sm:$0xff] }
  0x12   :  { %v2033_v35 = vld [vmem:[#allocation2 + $0x108] sm:$0xff]  ;;  %v2038_v36 = vld [vmem:[#allocation2 + $0x130] sm:$0xff]  ;;  %v2042_v38 = vld [vmem:[#allocation2 + $0x120] sm:$0xff] }
  0x13   :  { %3663 = vst [vmem:[#allocation10_spill] sm:$0xff] %v2038_v36  ;;  %v2040_v37 = vld [vmem:[#allocation2 + $0x128] sm:$0xff]  ;;  %v2049_v40 = vld [vmem:[#allocation2 + $0x140] sm:$0xff]  ;;  %v2051_v41 = vld [vmem:[#allocation2 + $0x138] sm:$0xff] }
  0x14   :  { %v2047_v39 = vld [vmem:[#allocation2 + $0x148] sm:$0xff]  ;;  %3665 = vst [vmem:[#allocation12_spill] sm:$0xff] %v2049_v40  ;;  %v2056_v42 = vld [vmem:[#allocation2 + $0x160] sm:$0xff]  ;;  %v2058_v43 = vld [vmem:[#allocation2 + $0x158] sm:$0xff] }
  0x15   :  { %3664 = vst [vmem:[#allocation11_spill] sm:$0xff] %v2047_v39  ;;  %v2060_v44 = vld [vmem:[#allocation2 + $0x150] sm:$0xff]  ;;  %v2071_v48 = vld [vmem:[#allocation2 + $0x178] sm:$0xff]  ;;  %v2075_v50 = vld [vmem:[#allocation2 + $0x168] sm:$0xff] }
  0x16   :  { %3666 = vst [vmem:[#allocation13_spill] sm:$0xff] %v2051_v41  ;;  %v2073_v49 = vld [vmem:[#allocation2 + $0x170] sm:$0xff]  ;;  %v2088_v55 = vld [vmem:[#allocation2 + $0x188] sm:$0xff]  ;;  %v2090_v56 = vld [vmem:[#allocation2 + $0x180] sm:$0xff] }
  0x17   :  { %108 = vadd.xlane.f32.xlu2 %v1948_v6  ;;  %106 = vadd.xlane.f32.xlu1 %v1950_v7  ;;  %3667 = vst [vmem:[#allocation14_spill] sm:$0xff] %v2056_v42  ;;  %v2086_v54 = vld [vmem:[#allocation2 + $0x190] sm:$0xff]  ;;  %v2101_v60 = vld [vmem:[#allocation2 + $0x1a8] sm:$0xff]  ;;  %v2103_v61 = vld [vmem:[#allocation2 + $0x1a0] sm:$0xff] }
  0x18   :  { %104 = vadd.xlane.f32.xlu0 %v1952_v8  ;;  %3668 = vst [vmem:[#allocation15_spill] sm:$0xff] %v2058_v43  ;;  %v2105_v62 = vld [vmem:[#allocation2 + $0x198] sm:$0xff] }
  0x19   :  { %3669 = vst [vmem:[#allocation16_spill] sm:$0xff] %v2060_v44 }
  0x1a   :  { %3670 = vst [vmem:[#allocation17_spill] sm:$0xff] %v2071_v48 }
  0x1b   :  { %3671 = vst [vmem:[#allocation18_spill] sm:$0xff] %v2073_v49 }
  0x1c   :  { %3672 = vst [vmem:[#allocation19_spill] sm:$0xff] %v2075_v50 }
  0x1d   :  { %3673 = vst [vmem:[#allocation20_spill] sm:$0xff] %v2086_v54 }
  0x1e   :  { %3674 = vst [vmem:[#allocation21_spill] sm:$0xff] %v2088_v55 }
  0x1f   :  { %114 = vadd.xlane.f32.xlu2 %v1957_v9  ;;  %112 = vadd.xlane.f32.xlu1 %v1959_v10  ;;  %3675 = vst [vmem:[#allocation22_spill] sm:$0xff] %v2090_v56 }
  0x20   :  { %110 = vadd.xlane.f32.xlu0 %v1961_v11  ;;  %3676 = vst [vmem:[#allocation23_spill] sm:$0xff] %v2101_v60 }
  0x21   :  { %3677 = vst [vmem:[#allocation24_spill] sm:$0xff] %v2103_v61 }
  0x22   :  { %3678 = vst [vmem:[#allocation25_spill] sm:$0xff] %v2105_v62 }
  0x27   :  { %120 = vadd.xlane.f32.xlu2 %v1966_v12  ;;  %118 = vadd.xlane.f32.xlu1 %v1968_v13 }
  0x28   :  { %116 = vadd.xlane.f32.xlu0 %v1970_v14 }
  0x2f   :  { %126 = vadd.xlane.f32.xlu2 %v1975_v15  ;;  %124 = vadd.xlane.f32.xlu1 %v1977_v16 }
  0x30   :  { %122 = vadd.xlane.f32.xlu0 %v1979_v17 }
  0x37   :  { %132 = vadd.xlane.f32.xlu2 %v1984_v18  ;;  %130 = vadd.xlane.f32.xlu1 %v1986_v19 }
  0x38   :  { %128 = vadd.xlane.f32.xlu0 %v1988_v20 }
  0x3f   :  { %138 = vadd.xlane.f32.xlu2 %v1993_v21  ;;  %136 = vadd.xlane.f32.xlu1 %v1995_v22 }
  0x40   :  { %134 = vadd.xlane.f32.xlu0 %v1997_v23 }
  0x47   :  { %144 = vadd.xlane.f32.xlu2 %v2002_v24  ;;  %142 = vadd.xlane.f32.xlu1 %v2004_v25 }
  0x48   :  { %140 = vadd.xlane.f32.xlu0 %v2006_v26 }
  0x4f   :  { %150 = vadd.xlane.f32.xlu2 %v2011_v27  ;;  %148 = vadd.xlane.f32.xlu1 %v2013_v28 }
  0x50   :  { %146 = vadd.xlane.f32.xlu0 %v2015_v29 }
  0x57   :  { %156 = vadd.xlane.f32.xlu2 %v2020_v30  ;;  %154 = vadd.xlane.f32.xlu1 %v2022_v31 }
  0x58   :  { %152 = vadd.xlane.f32.xlu0 %v2024_v32 }
  0x5f   :  { %162 = vadd.xlane.f32.xlu2 %v2029_v33  ;;  %160 = vadd.xlane.f32.xlu1 %v2031_v34 }
  0x60   :  { %158 = vadd.xlane.f32.xlu0 %v2033_v35 }
  0x67   :  { %168 = vadd.xlane.f32.xlu2 %v2038_v36  ;;  %166 = vadd.xlane.f32.xlu1 %v2040_v37  ;;  %v88_v36 = vld [vmem:[#allocation2 + $0x1e0] sm:$0xff] }
  0x68   :  { %164 = vadd.xlane.f32.xlu0 %v2042_v38 }
  0x6f   :  { %174 = vadd.xlane.f32.xlu2 %v2047_v39  ;;  %172 = vadd.xlane.f32.xlu1 %v2049_v40  ;;  %v2133_v39 = vld [vmem:[#allocation2 + $0x1c8] sm:$0xff] }
  0x70   :  { %170 = vadd.xlane.f32.xlu0 %v2051_v41  ;;  %3683 = vst [vmem:[#allocation30_spill] sm:$0xff] %v2133_v39 }
  0x77   :  { %180 = vadd.xlane.f32.xlu2 %v2056_v42  ;;  %178 = vadd.xlane.f32.xlu1 %v2058_v43  ;;  %v2120_v42 = vld [vmem:[#allocation2 + $0x1b0] sm:$0xff]  ;;  %v89_v43 = vld [vmem:[#allocation2 + $0x1e8] sm:$0xff] }
  0x78   :  { %176 = vadd.xlane.f32.xlu0 %v2060_v44  ;;  %3681 = vst [vmem:[#allocation28_spill] sm:$0xff] %v2120_v42  ;;  %v90_v44 = vld [vmem:[#allocation2 + $0x1f0] sm:$0xff] }
  0x7a   :  { %v2065_v45 = vpop.xlane.xlu2 %100  ;;  %v2067_v46 = vpop.xlane.xlu1 %96 }
  0x7b   :  { %v2069_v47 = vpop.xlane.xlu0 %92 }
  0x7f   :  { %186 = vadd.xlane.f32.xlu2 %v2071_v48  ;;  %184 = vadd.xlane.f32.xlu1 %v2073_v49  ;;  %v2131_v49 = vld [vmem:[#allocation2 + $0x1d0] sm:$0xff] }
  0x80   :  { %182 = vadd.xlane.f32.xlu0 %v2075_v50  ;;  %v87_v50 = vld [vmem:[#allocation2 + $0x1d8] sm:$0xff]  ;;  %3682 = vst [vmem:[#allocation29_spill] sm:$0xff] %v2131_v49 }
  0x82   :  { %v2080_v51 = vpop.xlane.xlu2 %102  ;;  %v2082_v52 = vpop.xlane.xlu1 %98 }
  0x83   :  { %v2084_v53 = vpop.xlane.xlu0 %94 }
  0x87   :  { %192 = vadd.xlane.f32.xlu2 %v2086_v54  ;;  %190 = vadd.xlane.f32.xlu1 %v2088_v55  ;;  %v2118_v55 = vld [vmem:[#allocation2 + $0x1b8] sm:$0xff] }
  0x88   :  { %188 = vadd.xlane.f32.xlu0 %v2090_v56  ;;  %v2116_v56 = vld [vmem:[#allocation2 + $0x1c0] sm:$0xff]  ;;  %3680 = vst [vmem:[#allocation27_spill] sm:$0xff] %v2118_v55 }
  0x89   :  { %3679 = vst [vmem:[#allocation26_spill] sm:$0xff] %v2116_v56 }
  0x8a   :  { %v2095_v57 = vpop.xlane.xlu2 %108  ;;  %v2097_v58 = vpop.xlane.xlu1 %106 }
  0x8b   :  { %v2099_v59 = vpop.xlane.xlu0 %104 }
  0x8f   :  { %198 = vadd.xlane.f32.xlu2 %v2101_v60  ;;  %196 = vadd.xlane.f32.xlu1 %v2103_v61 }
  0x90   :  { %194 = vadd.xlane.f32.xlu0 %v2105_v62 }
  0x92   :  { %v2110_v63 = vpop.xlane.xlu2 %114  ;;  %v2112_v54 = vpop.xlane.xlu1 %112 }
  0x93   :  { %v2114_v48 = vpop.xlane.xlu0 %110 }
  0x97   :  { %204 = vadd.xlane.f32.xlu2 %v2116_v56  ;;  %202 = vadd.xlane.f32.xlu1 %v2118_v55 }
  0x98   :  { %200 = vadd.xlane.f32.xlu0 %v2120_v42 }
  0x9a   :  { %v2125_v60 = vpop.xlane.xlu2 %120  ;;  %v2127_v62 = vpop.xlane.xlu1 %118 }
  0x9b   :  { %v2129_v61 = vpop.xlane.xlu0 %116 }
  0x9f   :  { %210 = vadd.xlane.f32.xlu2 %v87_v50  ;;  %208 = vadd.xlane.f32.xlu1 %v2131_v49  ;;  %v284_v49 = vmul.f32 %v1934_v2, %v1934_v2  ;;  %v291_v2 = vmul.f32 %v1950_v7, %v1950_v7  ;;  %v293_v7 = vmul.f32 %v1961_v11, %v1961_v11 }
  0xa0   :  { %206 = vadd.xlane.f32.xlu0 %v2133_v39  ;;  %v285_v39 = vmul.f32 %v1943_v5, %v1943_v5  ;;  %v286_v5 = vmul.f32 %v1932_v1, %v1932_v1  ;;  %v295_v11 = vmul.f32 %v1957_v9, %v1957_v9 }
  0xa2   :  { %v2137_v56 = vpop.xlane.xlu2 %126  ;;  %v2139_v55 = vpop.xlane.xlu1 %124 }
  0xa3   :  { %3684 = vst [vmem:[#allocation31_spill] sm:$0xff] %v2139_v55  ;;  %v2141_v42 = vpop.xlane.xlu0 %122  ;;  %v91_v55 = vld [vmem:[#allocation2 + $0x1f8] sm:$0xff] }
  0xa4   :  { %3685 = vst [vmem:[#allocation32_spill] sm:$0xff] %v2141_v42 }
  0xa7   :  { %216 = vadd.xlane.f32.xlu2 %v90_v44  ;;  %214 = vadd.xlane.f32.xlu1 %v89_v43  ;;  %v288_v44 = vmul.f32 %v1930_v0, %v1930_v0  ;;  %v290_v0 = vmul.f32 %v1952_v8, %v1952_v8  ;;  %v292_v8 = vmul.f32 %v1948_v6, %v1948_v6 }
  0xa8   :  { %212 = vadd.xlane.f32.xlu0 %v88_v36 }
  0xaa   :  { %v2143_v41 = vpop.xlane.xlu2 %132  ;;  %v2145_v40 = vpop.xlane.xlu1 %130 }
  0xab   :  { %v2147_v50 = vpop.xlane.xlu0 %128 }
  0xac   :  { %3686 = vst [vmem:[#allocation33_spill] sm:$0xff] %v2147_v50  ;;  %v287_v50 = vmul.f32 %v1941_v4, %v1941_v4  ;;  %v289_v4 = vmul.f32 %v1939_v3, %v1939_v3 }
  0xaf   :  { %350 = vadd.xlane.f32.xlu2 %v285_v39  ;;  %348 = vadd.xlane.f32.xlu1 %v284_v49 }
  0xb0   :  { %218 = vadd.xlane.f32.xlu0 %v91_v55 }
  0xb2   :  { %v2153_v42 = vpop.xlane.xlu2 %138  ;;  %v2155_v43 = vpop.xlane.xlu1 %136 }
  0xb3   :  { %v2157_v36 = vpop.xlane.xlu0 %134 }
  0xb7   :  { %356 = vadd.xlane.f32.xlu2 %v288_v44  ;;  %354 = vadd.xlane.f32.xlu1 %v287_v50  ;;  %v294_v44 = vmul.f32 %v1959_v10, %v1959_v10  ;;  %v296_v10 = vmul.f32 %v1970_v14, %v1970_v14  ;;  %v298_v14 = vmul.f32 %v1966_v12, %v1966_v12 }
  0xb8   :  { %352 = vadd.xlane.f32.xlu0 %v286_v5 }
  0xba   :  { %v2165_v39 = vpop.xlane.xlu2 %144  ;;  %v2167_v49 = vpop.xlane.xlu1 %142 }
  0xbb   :  { %v2169_v55 = vpop.xlane.xlu0 %140 }
  0xbf   :  { %362 = vadd.xlane.f32.xlu2 %v291_v2  ;;  %360 = vadd.xlane.f32.xlu1 %v290_v0 }
  0xc0   :  { %358 = vadd.xlane.f32.xlu0 %v289_v4  ;;  %v297_v4 = vmul.f32 %v1968_v13, %v1968_v13  ;;  %v299_v13 = vmul.f32 %v1979_v17, %v1979_v17  ;;  %v301_v17 = vmul.f32 %v1975_v15, %v1975_v15 }
  0xc2   :  { %v2177_v1 = vpop.xlane.xlu2 %150  ;;  %v2179_v5 = vpop.xlane.xlu1 %148 }
  0xc3   :  { %v2181_v50 = vpop.xlane.xlu0 %146 }
  0xc7   :  { %368 = vadd.xlane.f32.xlu2 %v294_v44  ;;  %366 = vadd.xlane.f32.xlu1 %v293_v7 }
  0xc8   :  { %364 = vadd.xlane.f32.xlu0 %v292_v8  ;;  %v300_v8 = vmul.f32 %v1977_v16, %v1977_v16  ;;  %v302_v16 = vmul.f32 %v1988_v20, %v1988_v20  ;;  %v304_v20 = vmul.f32 %v1984_v18, %v1984_v18 }
  0xca   :  { %v2189_v2 = vpop.xlane.xlu2 %156  ;;  %v2191_v3 = vpop.xlane.xlu1 %154 }
  0xcb   :  { %v2193_v0 = vpop.xlane.xlu0 %152 }
  0xcf   :  { %374 = vadd.xlane.f32.xlu2 %v297_v4  ;;  %372 = vadd.xlane.f32.xlu1 %v296_v10 }
  0xd0   :  { %370 = vadd.xlane.f32.xlu0 %v295_v11  ;;  %v303_v11 = vmul.f32 %v1986_v19, %v1986_v19  ;;  %v305_v19 = vmul.f32 %v1997_v23, %v1997_v23  ;;  %v307_v23 = vmul.f32 %v1993_v21, %v1993_v21 }
  0xd2   :  { %v2201_v6 = vpop.xlane.xlu2 %162  ;;  %v2203_v44 = vpop.xlane.xlu1 %160 }
  0xd3   :  { %v2205_v7 = vpop.xlane.xlu0 %158 }
  0xd7   :  { %380 = vadd.xlane.f32.xlu2 %v300_v8  ;;  %378 = vadd.xlane.f32.xlu1 %v299_v13 }
  0xd8   :  { %376 = vadd.xlane.f32.xlu0 %v298_v14  ;;  %v306_v14 = vmul.f32 %v1995_v22, %v1995_v22  ;;  %v308_v22 = vmul.f32 %v2006_v26, %v2006_v26  ;;  %v310_v26 = vmul.f32 %v2002_v24, %v2002_v24 }
  0xda   :  { %v2213_v9 = vpop.xlane.xlu2 %168  ;;  %v2215_v4 = vpop.xlane.xlu1 %166 }
  0xdb   :  { %v2217_v10 = vpop.xlane.xlu0 %164 }
  0xdf   :  { %386 = vadd.xlane.f32.xlu2 %v303_v11  ;;  %384 = vadd.xlane.f32.xlu1 %v302_v16 }
  0xe0   :  { %382 = vadd.xlane.f32.xlu0 %v301_v17  ;;  %v309_v17 = vmul.f32 %v2004_v25, %v2004_v25  ;;  %v311_v25 = vmul.f32 %v2015_v29, %v2015_v29  ;;  %v313_v29 = vmul.f32 %v2011_v27, %v2011_v27 }
  0xe2   :  { %v2225_v12 = vpop.xlane.xlu2 %174  ;;  %v2227_v8 = vpop.xlane.xlu1 %172 }
  0xe3   :  { %v2229_v13 = vpop.xlane.xlu0 %170 }
  0xe7   :  { %392 = vadd.xlane.f32.xlu2 %v306_v14  ;;  %390 = vadd.xlane.f32.xlu1 %v305_v19 }
  0xe8   :  { %388 = vadd.xlane.f32.xlu0 %v304_v20  ;;  %v312_v20 = vmul.f32 %v2013_v28, %v2013_v28  ;;  %v314_v28 = vmul.f32 %v2024_v32, %v2024_v32  ;;  %v316_v32 = vmul.f32 %v2020_v30, %v2020_v30  ;;  %v220_v30 = vmul.f32 0.0078125, %v2069_v47 }
  0xe9   :  { %v221_v47 = vmul.f32 0.0078125, %v2084_v53 }
  0xea   :  { %v2237_v15 = vpop.xlane.xlu2 %180  ;;  %v2239_v11 = vpop.xlane.xlu1 %178 }
  0xeb   :  { %v2241_v16 = vpop.xlane.xlu0 %176 }
  0xef   :  { %398 = vadd.xlane.f32.xlu2 %v309_v17  ;;  %396 = vadd.xlane.f32.xlu1 %v308_v22 }
  0xf0   :  { %394 = vadd.xlane.f32.xlu0 %v307_v23  ;;  %v315_v23 = vmul.f32 %v2022_v31, %v2022_v31  ;;  %v317_v31 = vmul.f32 %v2033_v35, %v2033_v35  ;;  %v320_v35 = vmul.f32 %v2042_v38, %v2042_v38 }
  0xf2   :  { %v2249_v18 = vpop.xlane.xlu2 %186  ;;  %v2251_v14 = vpop.xlane.xlu1 %184 }
  0xf3   :  { %v2253_v19 = vpop.xlane.xlu0 %182 }
  0xf7   :  { %404 = vadd.xlane.f32.xlu2 %v312_v20  ;;  %402 = vadd.xlane.f32.xlu1 %v311_v25 }
  0xf8   :  { %400 = vadd.xlane.f32.xlu0 %v310_v26  ;;  %v318_v26 = vmul.f32 %v2031_v34, %v2031_v34  ;;  %v321_v34 = vmul.f32 %v2040_v37, %v2040_v37 }
  0xfa   :  { %v2261_v21 = vpop.xlane.xlu2 %192  ;;  %v2263_v17 = vpop.xlane.xlu1 %190 }
  0xfb   :  { %v2265_v22 = vpop.xlane.xlu0 %188 }
  0xff   :  { %410 = vadd.xlane.f32.xlu2 %v315_v23  ;;  %408 = vadd.xlane.f32.xlu1 %v314_v28  ;;  %v224_v28 = vmul.f32 0.0078125, %v2065_v45 }
 0x100   :  { %406 = vadd.xlane.f32.xlu0 %v313_v29  ;;  %v222_v29 = vmul.f32 0.0078125, %v2067_v46 }
 0x101   :  { %v2302_v45 = vmul.f32 %v224_v28, %v224_v28  ;;  %v231_v28 = vmul.f32 0.0078125, %v2110_v63 }
 0x102   :  { %v2273_v24 = vpop.xlane.xlu2 %198  ;;  %v2275_v20 = vpop.xlane.xlu1 %196  ;;  %v2304_v46 = vmul.f32 %v222_v29, %v222_v29  ;;  %v230_v29 = vmul.f32 0.0078125, %v2112_v54  ;;  %v3697_v54 = vld [vmem:[#allocation13_spill] sm:$0xff] }
 0x103   :  { %v2277_v25 = vpop.xlane.xlu0 %194 }
 0x104   :  { %3687 = vst [vmem:[#allocation34_spill] sm:$0xff] %v2277_v25 }
 0x107   :  { %416 = vadd.xlane.f32.xlu2 %v318_v26  ;;  %414 = vadd.xlane.f32.xlu1 %v317_v31  ;;  %v225_v26 = vmul.f32 0.0078125, %v2080_v51  ;;  %v223_v31 = vmul.f32 0.0078125, %v2082_v52  ;;  %v228_v51 = vmul.f32 0.0078125, %v2095_v57  ;;  %v227_v52 = vmul.f32 0.0078125, %v2097_v58 }
 0x108   :  { %412 = vadd.xlane.f32.xlu0 %v316_v32  ;;  %v319_v32 = vmul.f32 %v2029_v33, %v2029_v33  ;;  %v226_v33 = vmul.f32 0.0078125, %v2099_v59  ;;  %v232_v57 = vmul.f32 0.0078125, %v2129_v61  ;;  %v237_v58 = vmul.f32 0.0078125, %v2137_v56  ;;  %v3696_v59 = vld [vmem:[#allocation12_spill] sm:$0xff] }
 0x109   :  { %v2308_v37 = vmul.f32 %v225_v26, %v225_v26  ;;  %v2310_v38 = vmul.f32 %v223_v31, %v223_v31  ;;  %v324_v63 = vmul.f32 %v3696_v59, %v3696_v59  ;;  %v2339_v61 = vmul.f32 %v228_v51, %v228_v51 }
 0x10a   :  { %v2285_v27 = vpop.xlane.xlu2 %204  ;;  %v2287_v23 = vpop.xlane.xlu1 %202  ;;  %v2341_v56 = vmul.f32 %v227_v52, %v227_v52  ;;  %v240_v59 = vmul.f32 0.0078125, %v2143_v41  ;;  %v239_v41 = vmul.f32 0.0078125, %v2145_v40 }
 0x10b   :  { %3688 = vst [vmem:[#allocation35_spill] sm:$0xff] %v2285_v27  ;;  %v2291_v25 = vpop.xlane.xlu0 %200  ;;  %v2346_v27 = vmul.f32 %v231_v28, %v231_v28 }
 0x10c   :  { %3689 = vst [vmem:[#allocation36_spill] sm:$0xff] %v2287_v23  ;;  %v3700_v23 = vld [vmem:[#allocation10_spill] sm:$0xff] }
 0x10d   :  { %3690 = vst [vmem:[#allocation37_spill] sm:$0xff] %v2291_v25  ;;  %v2306_v25 = vmul.f32 %v220_v30, %v220_v30  ;;  %v233_v30 = vmul.f32 0.0078125, %v2127_v62 }
 0x10e   :  { %3691 = vst [vmem:[#allocation38_spill] sm:$0xff] %v2308_v37  ;;  %v3699_v37 = vld [vmem:[#allocation32_spill] sm:$0xff] }
 0x10f   :  { %422 = vadd.xlane.f32.xlu2 %v321_v34  ;;  %420 = vadd.xlane.f32.xlu1 %v320_v35  ;;  %3692 = vst [vmem:[#allocation39_spill] sm:$0xff] %v2310_v38  ;;  %v229_v34 = vmul.f32 0.0078125, %v2114_v48  ;;  %v234_v35 = vmul.f32 0.0078125, %v2125_v60  ;;  %v323_v48 = vmul.f32 %v3697_v54, %v3697_v54  ;;  %v3698_v60 = vld [vmem:[#allocation31_spill] sm:$0xff]  ;;  %v2348_v54 = vmul.f32 %v230_v29, %v230_v29 }
 0x110   :  { %418 = vadd.xlane.f32.xlu0 %v319_v32  ;;  %v2333_v32 = vmul.f32 %v221_v47, %v221_v47  ;;  %v236_v62 = vmul.f32 0.0078125, %v3698_v60  ;;  %v2356_v38 = vmul.f32 %v232_v57, %v232_v57  ;;  %v2366_v29 = vmul.f32 %v240_v59, %v240_v59 }
 0x111   :  { %v2350_v47 = vmul.f32 %v229_v34, %v229_v34  ;;  %v2352_v60 = vmul.f32 %v234_v35, %v234_v35  ;;  %v243_v34 = vmul.f32 0.0078125, %v2153_v42  ;;  %v242_v35 = vmul.f32 0.0078125, %v2155_v43  ;;  %v3706_v43 = vld [vmem:[#allocation15_spill] sm:$0xff] }
 0x112   :  { %v2321_v26 = vpop.xlane.xlu2 %210  ;;  %v2323_v53 = vpop.xlane.xlu1 %208  ;;  %v2360_v51 = vmul.f32 %v236_v62, %v236_v62  ;;  %3702 = vst [vmem:[#allocation12_spill] sm:$0xff] %v2366_v29  ;;  %v246_v57 = vmul.f32 0.0078125, %v2165_v39  ;;  %v247_v42 = vmul.f32 0.0078125, %v2181_v50  ;;  %v3707_v39 = vld [vmem:[#allocation16_spill] sm:$0xff]  ;;  %v250_v59 = vmul.f32 0.0078125, %v2193_v0 }
 0x113   :  { %3693 = vst [vmem:[#allocation40_spill] sm:$0xff] %v2321_v26  ;;  %v2327_v31 = vpop.xlane.xlu0 %206  ;;  %v235_v26 = vmul.f32 0.0078125, %v3699_v37  ;;  %v2354_v37 = vmul.f32 %v233_v30, %v233_v30  ;;  %v241_v30 = vmul.f32 0.0078125, %v2157_v36  ;;  %v327_v36 = vmul.f32 %v3706_v43, %v3706_v43 }
 0x114   :  { %3694 = vst [vmem:[#allocation41_spill] sm:$0xff] %v2323_v53  ;;  %v322_v53 = vmul.f32 %v3700_v23, %v3700_v23  ;;  %v2358_v23 = vmul.f32 %v237_v58, %v237_v58  ;;  %v245_v58 = vmul.f32 0.0078125, %v2167_v49  ;;  %v326_v49 = vmul.f32 %v3707_v39, %v3707_v39 }
 0x115   :  { %3695 = vst [vmem:[#allocation42_spill] sm:$0xff] %v2327_v31  ;;  %v2343_v31 = vmul.f32 %v226_v33, %v226_v33  ;;  %v2362_v52 = vmul.f32 %v235_v26, %v235_v26  ;;  %v3701_v33 = vld [vmem:[#allocation33_spill] sm:$0xff]  ;;  %v244_v26 = vmul.f32 0.0078125, %v2169_v55  ;;  %v252_v55 = vmul.f32 0.0078125, %v2189_v2 }
 0x116   :  { %v238_v28 = vmul.f32 0.0078125, %v3701_v33  ;;  %v3708_v33 = vld [vmem:[#allocation11_spill] sm:$0xff]  ;;  %v2400_v43 = vmul.f32 %v241_v30, %v241_v30  ;;  %v2402_v39 = vmul.f32 %v246_v57, %v246_v57  ;;  %v2404_v2 = vmul.f32 %v245_v58, %v245_v58 }
 0x117   :  { %428 = vadd.xlane.f32.xlu2 %v324_v63  ;;  %426 = vadd.xlane.f32.xlu1 %v323_v48  ;;  %v249_v63 = vmul.f32 0.0078125, %v2177_v1  ;;  %v251_v1 = vmul.f32 0.0078125, %v2191_v3  ;;  %v2406_v3 = vmul.f32 %v244_v26, %v244_v26  ;;  %v255_v30 = vmul.f32 0.0078125, %v2201_v6 }
 0x118   :  { %424 = vadd.xlane.f32.xlu0 %v322_v53  ;;  %v248_v53 = vmul.f32 0.0078125, %v2179_v5  ;;  %v2392_v5 = vmul.f32 %v239_v41, %v239_v41  ;;  %v2394_v50 = vmul.f32 %v238_v28, %v238_v28  ;;  %v2412_v41 = vmul.f32 %v247_v42, %v247_v42 }
 0x119   :  { %v2408_v0 = vmul.f32 %v249_v63, %v249_v63  ;;  %v2414_v28 = vmul.f32 %v252_v55, %v252_v55  ;;  %v254_v57 = vmul.f32 0.0078125, %v2203_v44  ;;  %v253_v58 = vmul.f32 0.0078125, %v2205_v7 }
 0x11a   :  { %v2375_v40 = vpop.xlane.xlu2 %216  ;;  %v2377_v48 = vpop.xlane.xlu1 %214  ;;  %v2410_v29 = vmul.f32 %v248_v53, %v248_v53  ;;  %v258_v26 = vmul.f32 0.0078125, %v2213_v9  ;;  %v257_v63 = vmul.f32 0.0078125, %v2215_v4  ;;  %v256_v53 = vmul.f32 0.0078125, %v2217_v10  ;;  %v3712_v9 = vld [vmem:[#allocation19_spill] sm:$0xff] }
 0x11b   :  { %3703 = vst [vmem:[#allocation13_spill] sm:$0xff] %v2375_v40  ;;  %v2381_v62 = vpop.xlane.xlu0 %212  ;;  %v2398_v40 = vmul.f32 %v242_v35, %v242_v35  ;;  %v2418_v35 = vmul.f32 %v250_v59, %v250_v59  ;;  %v261_v42 = vmul.f32 0.0078125, %v2225_v12  ;;  %v3711_v59 = vld [vmem:[#allocation18_spill] sm:$0xff]  ;;  %v329_v4 = vmul.f32 %v3712_v9, %v3712_v9 }
 0x11c   :  { %3704 = vst [vmem:[#allocation31_spill] sm:$0xff] %v2377_v48  ;;  %v325_v48 = vmul.f32 %v3708_v33, %v3708_v33  ;;  %v330_v7 = vmul.f32 %v3711_v59, %v3711_v59  ;;  %v2435_v33 = vmul.f32 %v255_v30, %v255_v30  ;;  %v264_v10 = vmul.f32 0.0078125, %v2237_v15 }
 0x11d   :  { %3705 = vst [vmem:[#allocation32_spill] sm:$0xff] %v2381_v62  ;;  %v2396_v62 = vmul.f32 %v243_v34, %v243_v34  ;;  %v2416_v34 = vmul.f32 %v251_v1, %v251_v1  ;;  %v263_v12 = vmul.f32 0.0078125, %v2239_v11  ;;  %v2449_v9 = vmul.f32 %v257_v63, %v257_v63 }
 0x11e   :  { %3709 = vst [vmem:[#allocation10_spill] sm:$0xff] %v2414_v28  ;;  %v2441_v28 = vmul.f32 %v254_v57, %v254_v57  ;;  %v2451_v30 = vmul.f32 %v256_v53, %v256_v53  ;;  %v2453_v15 = vmul.f32 %v261_v42, %v261_v42  ;;  %v266_v63 = vmul.f32 0.0078125, %v2251_v14 }
 0x11f   :  { %434 = vadd.xlane.f32.xlu2 %v327_v36  ;;  %432 = vadd.xlane.f32.xlu1 %v326_v49  ;;  %v260_v36 = vmul.f32 0.0078125, %v2227_v8  ;;  %v259_v49 = vmul.f32 0.0078125, %v2229_v13  ;;  %3713 = vst [vmem:[#allocation15_spill] sm:$0xff] %v2435_v33  ;;  %v3714_v8 = vld [vmem:[#allocation14_spill] sm:$0xff]  ;;  %v265_v53 = vmul.f32 0.0078125, %v2253_v19 }
 0x120   :  { %430 = vadd.xlane.f32.xlu0 %v325_v48  ;;  %v328_v13 = vmul.f32 %v3714_v8, %v3714_v8  ;;  %3716 = vst [vmem:[#allocation11_spill] sm:$0xff] %v2453_v15  ;;  %v3728_v15 = vld [vmem:[#allocation39_spill] sm:$0xff] }
 0x121   :  { %v2455_v11 = vmul.f32 %v260_v36, %v260_v36  ;;  %v2457_v33 = vmul.f32 %v259_v49, %v259_v49  ;;  %v270_v49 = vmul.f32 0.0078125, %v2261_v21 }
 0x122   :  { %v351_v55 = vpop.xlane.xlu2 %350  ;;  %v349_v1 = vpop.xlane.xlu1 %348 }
 0x123   :  { %v477_v6 = vmul.f32 0.0078125, %v351_v55  ;;  %v2429_v48 = vpop.xlane.xlu0 %218  ;;  %v476_v44 = vmul.f32 0.0078125, %v349_v1  ;;  %v2443_v55 = vmul.f32 %v253_v58, %v253_v58  ;;  %3717 = vst [vmem:[#allocation18_spill] sm:$0xff] %v2455_v11  ;;  %v2459_v58 = vmul.f32 %v264_v10, %v264_v10  ;;  %v3721_v10 = vld [vmem:[#allocation21_spill] sm:$0xff] }
 0x124   :  { %3710 = vst [vmem:[#allocation33_spill] sm:$0xff] %v2429_v48  ;;  %v2447_v48 = vmul.f32 %v258_v26, %v258_v26  ;;  %v267_v26 = vmul.f32 0.0078125, %v2249_v18  ;;  %v333_v19 = vmul.f32 %v3721_v10, %v3721_v10  ;;  %v2490_v10 = vmul.f32 %v266_v63, %v266_v63 }
 0x125   :  { %v605_v1 = vsub.f32 %v477_v6, %v2333_v32  ;;  %v604_v59 = vsub.f32 %v476_v44, %v2306_v25  ;;  %3718 = vst [vmem:[#allocation19_spill] sm:$0xff] %v2457_v33  ;;  %v2461_v32 = vmul.f32 %v263_v12, %v263_v12  ;;  %v262_v25 = vmul.f32 0.0078125, %v2241_v16  ;;  %v3722_v12 = vld [vmem:[#allocation22_spill] sm:$0xff] }
 0x126   :  { %3715 = vst [vmem:[#allocation16_spill] sm:$0xff] %v2447_v48  ;;  %v269_v6 = vmul.f32 0.0078125, %v2263_v17  ;;  %v268_v44 = vmul.f32 0.0078125, %v2265_v22 }
 0x127   :  { %v669_v57 = vmax.f32 %v605_v1, 0.0  ;;  %v668_v8 = vmax.f32 %v604_v59, 0.0  ;;  %440 = vadd.xlane.f32.xlu2 %v330_v7  ;;  %438 = vadd.xlane.f32.xlu1 %v329_v4  ;;  %3719 = vst [vmem:[#allocation14_spill] sm:$0xff] %v2459_v58  ;;  %v273_v7 = vmul.f32 0.0078125, %v2273_v24  ;;  %v3723_v1 = vld [vmem:[#allocation17_spill] sm:$0xff]  ;;  %v2483_v24 = vmul.f32 %v262_v25, %v262_v25 }
 0x128   :  { %3720 = vst [vmem:[#allocation43_spill] sm:$0xff] %v2461_v32  ;;  %436 = vadd.xlane.f32.xlu0 %v328_v13  ;;  %v332_v13 = vmul.f32 %v3722_v12, %v3722_v12  ;;  %v331_v22 = vmul.f32 %v3723_v1, %v3723_v1  ;;  %v272_v59 = vmul.f32 0.0078125, %v2275_v20  ;;  %v2488_v58 = vmul.f32 %v267_v26, %v267_v26 }
 0x129   :  { %v2467_v42 = vadd.f32 1e-05, %v669_v57  ;;  %v2469_v36 = vadd.f32 1e-05, %v668_v8  ;;  %3724 = vst [vmem:[#allocation21_spill] sm:$0xff] %v2483_v24  ;;  %v3725_v57 = vld [vmem:[#allocation34_spill] sm:$0xff]  ;;  %v2496_v32 = vmul.f32 %v270_v49, %v270_v49  ;;  %v2498_v25 = vmul.f32 %v269_v6, %v269_v6 }
 0x12a   :  { %v357_v16 = vpop.xlane.xlu2 %356  ;;  %v355_v4 = vpop.xlane.xlu1 %354  ;;  %v271_v8 = vmul.f32 0.0078125, %v3725_v57  ;;  %3726 = vst [vmem:[#allocation22_spill] sm:$0xff] %v2488_v58  ;;  %v2500_v20 = vmul.f32 %v268_v44, %v268_v44  ;;  %v3737_v44 = vld [vmem:[#allocation36_spill] sm:$0xff]  ;;  %v3742_v58 = vld [vmem:[#allocation27_spill] sm:$0xff] }
 0x12b   :  { %1656 = vrsqrt.f32 %v2467_v42  ;;  %v480_v18 = vmul.f32 0.0078125, %v357_v16  ;;  %v353_v14 = vpop.xlane.xlu0 %352  ;;  %v479_v17 = vmul.f32 0.0078125, %v355_v4  ;;  %3727 = vst [vmem:[#allocation17_spill] sm:$0xff] %v2490_v10  ;;  %v2494_v4 = vmul.f32 %v265_v53, %v265_v53  ;;  %v3736_v53 = vld [vmem:[#allocation35_spill] sm:$0xff]  ;;  %v3744_v10 = vld [vmem:[#allocation38_spill] sm:$0xff] }
 0x12c   :  { %1658 = vrsqrt.f32 %v2469_v36  ;;  %v478_v21 = vmul.f32 0.0078125, %v353_v14  ;;  %3730 = vst [vmem:[#allocation39_spill] sm:$0xff] %v2496_v32  ;;  %v2511_v49 = vmul.f32 0.0078125, %v3736_v53  ;;  %v3740_v53 = vld [vmem:[#allocation37_spill] sm:$0xff]  ;;  %vm812_vm0 = vweird.f32 %v2467_v42 }
 0x12d   :  { %v608_v16 = vsub.f32 %v480_v18, %v2302_v45  ;;  %v607_v14 = vsub.f32 %v479_v17, %v3728_v15  ;;  %3729 = vst [vmem:[#allocation34_spill] sm:$0xff] %v2494_v4  ;;  %v2502_v45 = vmul.f32 %v273_v7, %v273_v7  ;;  %v2508_v15 = vmul.f32 %v271_v8, %v271_v8 }
 0x12e   :  { %v606_v12 = vsub.f32 %v478_v21, %v2304_v46  ;;  %3731 = vst [vmem:[#allocation44_spill] sm:$0xff] %v2498_v25  ;;  %v2506_v46 = vmul.f32 %v272_v59, %v272_v59  ;;  %vm802_vm2 = vweird.f32 %v2469_v36 }
 0x12f   :  { %v672_v1 = vmax.f32 %v608_v16, 0.0  ;;  %446 = vadd.xlane.f32.xlu2 %v333_v19  ;;  %444 = vadd.xlane.f32.xlu1 %v332_v13  ;;  %3732 = vst [vmem:[#allocation45_spill] sm:$0xff] %v2500_v20  ;;  %v671_v63 = vmax.f32 %v607_v14, 0.0  ;;  %v2518_v13 = vmul.f32 0.0078125, %v3737_v44  ;;  %v3738_v16 = vld [vmem:[#allocation24_spill] sm:$0xff]  ;;  %v3739_v14 = vld [vmem:[#allocation25_spill] sm:$0xff] }
 0x130   :  { %3733 = vst [vmem:[#allocation46_spill] sm:$0xff] %v2502_v45  ;;  %v670_v26 = vmax.f32 %v606_v12, 0.0  ;;  %442 = vadd.xlane.f32.xlu0 %v331_v22  ;;  %v336_v12 = vmul.f32 %v3738_v16, %v3738_v16  ;;  %v2534_v44 = vmul.f32 0.0078125, %v3740_v53  ;;  %v3743_v53 = vld [vmem:[#allocation23_spill] sm:$0xff] }
 0x131   :  { %v2504_v18 = vpop.eup %1656  ;;  %3734 = vst [vmem:[#allocation47_spill] sm:$0xff] %v2506_v46  ;;  %v2513_v6 = vadd.f32 1e-05, %v672_v1  ;;  %v2524_v17 = vadd.f32 1e-05, %v671_v63  ;;  %v335_v1 = vmul.f32 %v3739_v14, %v3739_v14  ;;  %v3741_v63 = vld [vmem:[#allocation20_spill] sm:$0xff]  ;;  %v339_v14 = vmul.f32 %v3742_v58, %v3742_v58 }
 0x132   :  { %3735 = vst [vmem:[#allocation48_spill] sm:$0xff] %v2508_v15  ;;  %v2515_v19 = vpop.eup %1658  ;;  %v807_v7 = vmul.f32 %v2504_v18, %v2467_v42  ;;  %v2522_v21 = vadd.f32 1e-05, %v670_v26  ;;  %v363_v22 = vpop.xlane.xlu2 %362  ;;  %v334_v45 = vmul.f32 %v3741_v63, %v3741_v63  ;;  %v337_v25 = vmul.f32 %v3743_v53, %v3743_v53 }
 0x133   :  { %v797_v59 = vmul.f32 %v2515_v19, %v2469_v36  ;;  %1660 = vrsqrt.f32 %v2513_v6  ;;  %v359_v57 = vpop.xlane.xlu0 %358  ;;  %v361_v8 = vpop.xlane.xlu1 %360  ;;  %v483_v32 = vmul.f32 0.0078125, %v363_v22  ;;  %vm813_vm1 = vweird.f32 %v2504_v18 }
 0x134   :  { %v808_v26 = vmul.f32 %v2504_v18, %v807_v7  ;;  %1662 = vrsqrt.f32 %v2522_v21  ;;  %v481_v46 = vmul.f32 0.0078125, %v359_v57  ;;  %v482_v20 = vmul.f32 0.0078125, %v361_v8  ;;  %vm814_vm5 = vmor %vm812_vm0, %vm813_vm1 }
 0x135   :  { %v798_v15 = vmul.f32 %v2515_v19, %v797_v59  ;;  %1664 = vrsqrt.f32 %v2524_v17  ;;  %v611_v4 = vsub.f32 %v483_v32, %v2341_v56  ;;  %v3745_v59 = vld [vmem:[#allocation28_spill] sm:$0xff]  ;;  %vm803_vm3 = vweird.f32 %v2515_v19 }
 0x136   :  { %v809_v16 = vmul.f32 0.5, %v808_v26  ;;  %v609_v24 = vsub.f32 %v481_v46, %v3744_v10  ;;  %v338_v63 = vmul.f32 %v3745_v59, %v3745_v59  ;;  %v610_v58 = vsub.f32 %v482_v20, %v2343_v31  ;;  %v3746_v20 = vld [vmem:[#allocation29_spill] sm:$0xff]  ;;  %vm804_vm7 = vmor %vm802_vm2, %vm803_vm3  ;;  %v3747_v59 = vld [vmem:[#allocation26_spill] sm:$0xff] }
 0x137   :  { %v799_v7 = vmul.f32 0.5, %v798_v15  ;;  %452 = vadd.xlane.f32.xlu2 %v336_v12  ;;  %450 = vadd.xlane.f32.xlu1 %v335_v1  ;;  %v675_v56 = vmax.f32 %v611_v4, 0.0  ;;  %vm842_vm4 = vweird.f32 %v2513_v6  ;;  %v2572_v4 = vld [vmem:[%s3636_s1] ss:$0 sm:$0xff]  ;;  %vm822_vm6 = vweird.f32 %v2522_v21 }
 0x138   :  { %v810_v22 = vsub.f32 1.5, %v809_v16  ;;  %448 = vadd.xlane.f32.xlu0 %v334_v45  ;;  %v673_v8 = vmax.f32 %v609_v24, 0.0  ;;  %v2565_v45 = vmul.f32 %v3746_v20, %v3746_v20  ;;  %v674_v16 = vmax.f32 %v610_v58, 0.0 }
 0x139   :  { %v2553_v57 = vpop.eup %1660  ;;  %v800_v15 = vsub.f32 1.5, %v799_v7  ;;  %v2582_v26 = vadd.f32 1e-05, %v675_v56  ;;  %vm832_vm8 = vweird.f32 %v2524_v17 }
 0x13a   :  { %v2557_v32 = vpop.eup %1662  ;;  %v811_v10 = vmul.f32 %v2504_v18, %v810_v22  ;;  %v837_v46 = vmul.f32 %v2553_v57, %v2513_v6  ;;  %v369_v31 = vpop.xlane.xlu2 %368  ;;  %v2595_v22 = vmul.f32 %v3747_v59, %v3747_v59  ;;  %vm843_vm9 = vweird.f32 %v2553_v57 }
 0x13b   :  { %v2567_v12 = vpop.eup %1664  ;;  %v801_v1 = vmul.f32 %v2515_v19, %v800_v15  ;;  %v817_v24 = vmul.f32 %v2557_v32, %v2522_v21  ;;  %v3748_v15 = vld [vmem:[#allocation9_spill] sm:$0xff]  ;;  %1666 = vrsqrt.f32 %v2582_v26  ;;  %v365_v36 = vpop.xlane.xlu0 %364  ;;  %v2605_v11 = vadd.f32 1e-05, %v673_v8  ;;  %vm844_vm12 = vmor %vm842_vm4, %vm843_vm9  ;;  %v1785_v21 = vld [vmem:[#allocation2 + $0x10] sm:$0xff] }
 0x13c   :  { %v815_v53 = vsel %vm814_vm5, %v2504_v18, %v811_v10  ;;  %v838_v42 = vmul.f32 %v2553_v57, %v837_v46  ;;  %v827_v7 = vmul.f32 %v2567_v12, %v2524_v17  ;;  %v3749_v10 = vld [vmem:[#allocation8_spill] sm:$0xff]  ;;  %vm823_vm10 = vweird.f32 %v2557_v32 }
 0x13d   :  { %v1438_v58 = vmul.f32 %v815_v53, %v3748_v15  ;;  %v805_v18 = vsel %vm804_vm7, %v2515_v19, %v801_v1  ;;  %v818_v56 = vmul.f32 %v2557_v32, %v817_v24  ;;  %v2607_v53 = vadd.f32 1e-05, %v674_v16  ;;  %vm824_vm13 = vmor %vm822_vm6, %vm823_vm10 }
 0x13e   :  { %v1437_v46 = vmul.f32 %v805_v18, %v3749_v10  ;;  %v839_v20 = vmul.f32 0.5, %v838_v42  ;;  %v828_v33 = vmul.f32 %v2567_v12, %v827_v7  ;;  %v486_v15 = vmul.f32 0.0078125, %v369_v31  ;;  %v367_v18 = vpop.xlane.xlu1 %366  ;;  %v3750_v7 = vld [vmem:[#allocation30_spill] sm:$0xff] }
 0x13f   :  { %v1505_v48 = vmul.f32 %v2572_v4, %v1438_v58  ;;  %v819_v59 = vmul.f32 0.5, %v818_v56  ;;  %458 = vadd.xlane.f32.xlu2 %v339_v14  ;;  %456 = vadd.xlane.f32.xlu1 %v338_v63  ;;  %vm833_vm11 = vweird.f32 %v2567_v12  ;;  %1668 = vrsqrt.f32 %v2605_v11 }
 0x140   :  { %v1504_v19 = vmul.f32 %v2572_v4, %v1437_v46  ;;  %v840_v1 = vsub.f32 1.5, %v839_v20  ;;  %v829_v24 = vmul.f32 0.5, %v828_v33  ;;  %454 = vadd.xlane.f32.xlu0 %v337_v25  ;;  %1670 = vrsqrt.f32 %v2607_v53  ;;  %v1784_v46 = vld [vmem:[#allocation2 + $0x20] sm:$0xff]  ;;  %vm834_vm14 = vmor %vm832_vm8, %vm833_vm11 }
 0x141   :  { %1569 = vst [vmem:[#allocation5 + $0x8] sm:$0xff] %v1505_v48  ;;  %v820_v42 = vsub.f32 1.5, %v819_v59  ;;  %v614_v63 = vsub.f32 %v486_v15, %v2348_v54  ;;  %v2616_v31 = vpop.eup %1666  ;;  %v484_v25 = vmul.f32 0.0078125, %v365_v36  ;;  %v485_v16 = vmul.f32 0.0078125, %v367_v18 }
 0x142   :  { %1568 = vst [vmem:[#allocation5] sm:$0xff] %v1504_v19  ;;  %v841_v8 = vmul.f32 %v2553_v57, %v840_v1  ;;  %v830_v14 = vsub.f32 1.5, %v829_v24  ;;  %v375_v33 = vpop.xlane.xlu2 %374  ;;  %v341_v58 = vmul.f32 %v3750_v7, %v3750_v7  ;;  %v867_v6 = vmul.f32 %v2616_v31, %v2582_v26 }
 0x143   :  { %v821_v48 = vmul.f32 %v2557_v32, %v820_v42  ;;  %v489_v10 = vmul.f32 0.0078125, %v375_v33  ;;  %v612_v59 = vsub.f32 %v484_v25, %v2339_v61  ;;  %v613_v15 = vsub.f32 %v485_v16, %v2350_v47  ;;  %v1786_v42 = vld [vmem:[#allocation2 + $0x18] sm:$0xff] }
 0x144   :  { %v845_v56 = vsel %vm844_vm12, %v2553_v57, %v841_v8  ;;  %v831_v54 = vmul.f32 %v2567_v12, %v830_v14  ;;  %v678_v57 = vmax.f32 %v614_v63, 0.0  ;;  %v868_v24 = vmul.f32 %v2616_v31, %v867_v6  ;;  %v371_v63 = vpop.xlane.xlu0 %370 }
 0x145   :  { %v1441_v20 = vmul.f32 %v1784_v46, %v845_v56  ;;  %v825_v36 = vsel %vm824_vm13, %v2557_v32, %v821_v48  ;;  %v2642_v18 = vpop.eup %1668  ;;  %v676_v17 = vmax.f32 %v612_v59, 0.0  ;;  %vm872_vm15 = vweird.f32 %v2582_v26 }
 0x146   :  { %v1439_v19 = vmul.f32 %v1785_v21, %v825_v36  ;;  %v835_v1 = vsel %vm834_vm14, %v2567_v12, %v831_v54  ;;  %v2645_v14 = vadd.f32 1e-05, %v678_v57  ;;  %v2648_v61 = vpop.eup %1670  ;;  %v869_v33 = vmul.f32 0.5, %v868_v24  ;;  %v373_v6 = vpop.xlane.xlu1 %372 }
 0x147   :  { %v1508_v32 = vmul.f32 %v2572_v4, %v1441_v20  ;;  %v1440_v8 = vmul.f32 %v1786_v42, %v835_v1  ;;  %464 = vadd.xlane.f32.xlu2 %v2565_v45  ;;  %462 = vadd.xlane.f32.xlu1 %v341_v58  ;;  %v847_v47 = vmul.f32 %v2642_v18, %v2605_v11  ;;  %vm852_vm0 = vweird.f32 %v2605_v11  ;;  %v1788_v11 = vld [vmem:[#allocation2 + $0x28] sm:$0xff] }
 0x148   :  { %v1506_v12 = vmul.f32 %v2572_v4, %v1439_v19  ;;  %460 = vadd.xlane.f32.xlu0 %v2595_v22  ;;  %v857_v45 = vmul.f32 %v2648_v61, %v2607_v53  ;;  %1672 = vrsqrt.f32 %v2645_v14  ;;  %v870_v25 = vsub.f32 1.5, %v869_v33 }
 0x149   :  { %1572 = vst [vmem:[#allocation5 + $0x20] sm:$0xff] %v1508_v32  ;;  %v1507_v48 = vmul.f32 %v2572_v4, %v1440_v8  ;;  %vm873_vm1 = vweird.f32 %v2616_v31  ;;  %v848_v16 = vmul.f32 %v2642_v18, %v847_v47  ;;  %v2662_v7 = vadd.f32 1e-05, %v676_v17 }
 0x14a   :  { %1570 = vst [vmem:[#allocation5 + $0x10] sm:$0xff] %v1506_v12  ;;  %v858_v22 = vmul.f32 %v2648_v61, %v857_v45  ;;  %v677_v58 = vmax.f32 %v613_v15, 0.0  ;;  %v617_v56 = vsub.f32 %v489_v10, %v2354_v37  ;;  %v487_v54 = vmul.f32 0.0078125, %v371_v63  ;;  %vm874_vm3 = vmor %vm872_vm15, %vm873_vm1  ;;  %v381_v19 = vpop.xlane.xlu2 %380  ;;  %v1787_v15 = vld [vmem:[#allocation2 + $0x38] sm:$0xff] }
 0x14b   :  { %1571 = vst [vmem:[#allocation5 + $0x18] sm:$0xff] %v1507_v48  ;;  %v871_v46 = vmul.f32 %v2616_v31, %v870_v25  ;;  %v849_v20 = vmul.f32 0.5, %v848_v16  ;;  %vm862_vm2 = vweird.f32 %v2607_v53  ;;  %1674 = vrsqrt.f32 %v2662_v7 }
 0x14c   :  { %v859_v36 = vmul.f32 0.5, %v858_v22  ;;  %v2671_v57 = vadd.f32 1e-05, %v677_v58  ;;  %v681_v59 = vmax.f32 %v617_v56, 0.0  ;;  %v615_v21 = vsub.f32 %v487_v54, %v2346_v27  ;;  %v377_v47 = vpop.xlane.xlu0 %376 }
 0x14d   :  { %v875_v37 = vsel %vm874_vm3, %v2616_v31, %v871_v46  ;;  %v850_v10 = vsub.f32 1.5, %v849_v20  ;;  %vm853_vm4 = vweird.f32 %v2642_v18  ;;  %v488_v1 = vmul.f32 0.0078125, %v373_v6 }
 0x14e   :  { %v2676_v24 = vpop.eup %1672  ;;  %v1444_v32 = vmul.f32 %v1787_v15, %v875_v37  ;;  %v860_v42 = vsub.f32 1.5, %v859_v36  ;;  %vm863_vm5 = vweird.f32 %v2648_v61  ;;  %1676 = vrsqrt.f32 %v2671_v57  ;;  %vm854_vm6 = vmor %vm852_vm0, %vm853_vm4 }
 0x14f   :  { %v851_v26 = vmul.f32 %v2642_v18, %v850_v10  ;;  %v897_v27 = vmul.f32 %v2676_v24, %v2645_v14  ;;  %v2683_v8 = vadd.f32 1e-05, %v681_v59  ;;  %v492_v31 = vmul.f32 0.0078125, %v381_v19  ;;  %vm864_vm7 = vmor %vm862_vm2, %vm863_vm5 }
 0x150   :  { %v1511_v17 = vmul.f32 %v2572_v4, %v1444_v32  ;;  %v861_v63 = vmul.f32 %v2648_v61, %v860_v42  ;;  %v679_v12 = vmax.f32 %v615_v21, 0.0  ;;  %v616_v33 = vsub.f32 %v488_v1, %v2356_v38 }
 0x151   :  { %v2690_v48 = vpop.eup %1674  ;;  %v855_v45 = vsel %vm854_vm6, %v2642_v18, %v851_v26  ;;  %v898_v25 = vmul.f32 %v2676_v24, %v897_v27  ;;  %vm902_vm8 = vweird.f32 %v2645_v14  ;;  %1678 = vrsqrt.f32 %v2683_v8  ;;  %v1789_v18 = vld [vmem:[#allocation2 + $0x30] sm:$0xff] }
 0x152   :  { %1575 = vst [vmem:[#allocation5 + $0x38] sm:$0xff] %v1511_v17  ;;  %v1442_v16 = vmul.f32 %v1788_v11, %v855_v45  ;;  %v865_v22 = vsel %vm864_vm7, %v2648_v61, %v861_v63  ;;  %v877_v38 = vmul.f32 %v2690_v48, %v2662_v7  ;;  %vm882_vm9 = vweird.f32 %v2662_v7 }
 0x153   :  { %v1443_v58 = vmul.f32 %v1789_v18, %v865_v22  ;;  %v899_v53 = vmul.f32 0.5, %v898_v25  ;;  %v2702_v56 = vadd.f32 1e-05, %v679_v12  ;;  %v680_v54 = vmax.f32 %v616_v33, 0.0  ;;  %v387_v25 = vpop.xlane.xlu2 %386 }
 0x154   :  { %v2704_v6 = vpop.eup %1676  ;;  %v1509_v46 = vmul.f32 %v2572_v4, %v1442_v16  ;;  %v878_v20 = vmul.f32 %v2690_v48, %v877_v38  ;;  %v620_v36 = vsub.f32 %v492_v31, %v2360_v51  ;;  %v490_v61 = vmul.f32 0.0078125, %v377_v47  ;;  %v379_v31 = vpop.xlane.xlu1 %378 }
 0x155   :  { %v1510_v59 = vmul.f32 %v2572_v4, %v1443_v58  ;;  %v900_v21 = vsub.f32 1.5, %v899_v53  ;;  %vm903_vm10 = vweird.f32 %v2676_v24  ;;  %v887_v19 = vmul.f32 %v2704_v6, %v2671_v57  ;;  %v383_v11 = vpop.xlane.xlu0 %382 }
 0x156   :  { %1573 = vst [vmem:[#allocation5 + $0x28] sm:$0xff] %v1509_v46  ;;  %v879_v37 = vmul.f32 0.5, %v878_v20  ;;  %vm892_vm11 = vweird.f32 %v2671_v57  ;;  %1680 = vrsqrt.f32 %v2702_v56  ;;  %v2715_v10 = vadd.f32 1e-05, %v680_v54  ;;  %vm904_vm12 = vmor %vm902_vm8, %vm903_vm10  ;;  %v1791_v54 = vld [vmem:[#allocation2 + $0x40] sm:$0xff]  ;;  %v1792_v57 = vld [vmem:[#allocation2 + $0x48] sm:$0xff] }
 0x157   :  { %v2717_v1 = vpop.eup %1678  ;;  %1574 = vst [vmem:[#allocation5 + $0x30] sm:$0xff] %v1510_v59  ;;  %v901_v51 = vmul.f32 %v2676_v24, %v900_v21  ;;  %v888_v15 = vmul.f32 %v2704_v6, %v887_v19  ;;  %v684_v32 = vmax.f32 %v620_v36, 0.0  ;;  %v618_v42 = vsub.f32 %v490_v61, %v2352_v60  ;;  %v1790_v60 = vld [vmem:[#allocation2 + $0x50] sm:$0xff] }
 0x158   :  { %v880_v26 = vsub.f32 1.5, %v879_v37  ;;  %vm883_vm13 = vweird.f32 %v2690_v48  ;;  %v927_v27 = vmul.f32 %v2717_v1, %v2683_v8  ;;  %1682 = vrsqrt.f32 %v2715_v10 }
 0x159   :  { %v905_v17 = vsel %vm904_vm12, %v2676_v24, %v901_v51  ;;  %v889_v63 = vmul.f32 0.5, %v888_v15  ;;  %vm932_vm14 = vweird.f32 %v2683_v8  ;;  %v2730_v12 = vadd.f32 1e-05, %v684_v32  ;;  %vm884_vm15 = vmor %vm882_vm9, %vm883_vm13 }
 0x15a   :  { %v1447_v33 = vmul.f32 %v1790_v60, %v905_v17  ;;  %v881_v14 = vmul.f32 %v2690_v48, %v880_v26  ;;  %v928_v47 = vmul.f32 %v2717_v1, %v927_v27  ;;  %v682_v45 = vmax.f32 %v618_v42, 0.0  ;;  %v1793_v26 = vld [vmem:[#allocation2 + $0x1e8] sm:$0xff] }
 0x15b   :  { %v890_v24 = vsub.f32 1.5, %v889_v63  ;;  %vm893_vm0 = vweird.f32 %v2704_v6  ;;  %1684 = vrsqrt.f32 %v2730_v12  ;;  %v491_v16 = vmul.f32 0.0078125, %v379_v31  ;;  %v1794_v31 = vld [vmem:[#allocation2 + $0x1d8] sm:$0xff] }
 0x15c   :  { %v2740_v22 = vpop.eup %1680  ;;  %v1514_v38 = vmul.f32 %v2572_v4, %v1447_v33  ;;  %v885_v18 = vsel %vm884_vm15, %v2690_v48, %v881_v14  ;;  %v929_v58 = vmul.f32 0.5, %v928_v47  ;;  %v2744_v53 = vadd.f32 1e-05, %v682_v45  ;;  %vm894_vm2 = vmor %vm892_vm11, %vm893_vm0  ;;  %v385_v8 = vpop.xlane.xlu1 %384  ;;  %v1795_v14 = vld [vmem:[#allocation2 + $0x68] sm:$0xff] }
 0x15d   :  { %v1445_v46 = vmul.f32 %v1791_v54, %v885_v18  ;;  %v891_v7 = vmul.f32 %v2704_v6, %v890_v24  ;;  %v907_v20 = vmul.f32 %v2740_v22, %v2702_v56  ;;  %vm912_vm1 = vweird.f32 %v2702_v56  ;;  %v1796_v18 = vld [vmem:[#allocation2 + $0x1e0] sm:$0xff] }
 0x15e   :  { %v2750_v36 = vpop.eup %1682  ;;  %1578 = vst [vmem:[#allocation5 + $0x50] sm:$0xff] %v1514_v38  ;;  %v930_v48 = vsub.f32 1.5, %v929_v58  ;;  %vm933_vm3 = vweird.f32 %v2717_v1  ;;  %1686 = vrsqrt.f32 %v2744_v53  ;;  %v619_v61 = vsub.f32 %v491_v16, %v2362_v52 }
 0x15f   :  { %v1512_v59 = vmul.f32 %v2572_v4, %v1445_v46  ;;  %v895_v21 = vsel %vm894_vm2, %v2704_v6, %v891_v7  ;;  %v908_v19 = vmul.f32 %v2740_v22, %v907_v20  ;;  %v917_v37 = vmul.f32 %v2750_v36, %v2715_v10  ;;  %vm934_vm6 = vmor %vm932_vm14, %vm933_vm3  ;;  %v393_v7 = vpop.xlane.xlu2 %392  ;;  %v2785_v20 = vpop.xlane.xlu0 %388 }
 0x160   :  { %vm922_vm4 = vweird.f32 %v2715_v10  ;;  %v1446_v51 = vmul.f32 %v1792_v57, %v895_v21  ;;  %v931_v15 = vmul.f32 %v2717_v1, %v930_v48  ;;  %vm913_vm5 = vweird.f32 %v2740_v22 }
 0x161   :  { %v683_v32 = vmax.f32 %v619_v61, 0.0  ;;  %v2767_v42 = vpop.eup %1684  ;;  %1576 = vst [vmem:[#allocation5 + $0x40] sm:$0xff] %v1512_v59  ;;  %v909_v52 = vmul.f32 0.5, %v908_v19  ;;  %v918_v6 = vmul.f32 %v2750_v36, %v917_v37  ;;  %v345_v27 = vmul.f32 %v1793_v26, %v1793_v26  ;;  %vm914_vm9 = vmor %vm912_vm1, %vm913_vm5 }
 0x162   :  { %v343_v17 = vmul.f32 %v1794_v31, %v1794_v31  ;;  %v1513_v63 = vmul.f32 %v2572_v4, %v1446_v51  ;;  %v935_v60 = vsel %vm934_vm6, %v2717_v1, %v931_v15  ;;  %vm923_vm7 = vweird.f32 %v2750_v36  ;;  %v1797_v51 = vld [vmem:[#allocation2 + $0x58] sm:$0xff] }
 0x163   :  { %v957_v33 = vmul.f32 %v2767_v42, %v2730_v12  ;;  %vm962_vm8 = vweird.f32 %v2730_v12  ;;  %v1450_v47 = vmul.f32 %v1795_v14, %v935_v60  ;;  %v910_v45 = vsub.f32 1.5, %v909_v52  ;;  %470 = vadd.xlane.f32.xlu2 %v345_v27  ;;  %vm924_vm12 = vmor %vm922_vm4, %vm923_vm7  ;;  %v1798_v27 = vld [vmem:[#allocation2 + $0x1f0] sm:$0xff] }
 0x164   :  { %v919_v24 = vmul.f32 0.5, %v918_v6  ;;  %v2780_v16 = vadd.f32 1e-05, %v683_v32  ;;  %466 = vadd.xlane.f32.xlu0 %v343_v17  ;;  %v2782_v38 = vpop.eup %1686  ;;  %1577 = vst [vmem:[#allocation5 + $0x48] sm:$0xff] %v1513_v63  ;;  %v344_v58 = vmul.f32 %v1796_v18, %v1796_v18  ;;  %v495_v54 = vmul.f32 0.0078125, %v387_v25  ;;  %v391_v12 = vpop.xlane.xlu1 %390 }
 0x165   :  { %v958_v1 = vmul.f32 %v2767_v42, %v957_v33  ;;  %v493_v46 = vmul.f32 0.0078125, %v383_v11  ;;  %v1517_v48 = vmul.f32 %v2572_v4, %v1450_v47  ;;  %v911_v61 = vmul.f32 %v2740_v22, %v910_v45 }
 0x166   :  { %v920_v59 = vsub.f32 1.5, %v919_v24  ;;  %v937_v21 = vmul.f32 %v2782_v38, %v2744_v53  ;;  %vm963_vm10 = vweird.f32 %v2767_v42  ;;  %vm943_vm11 = vweird.f32 %v2782_v38  ;;  %468 = vadd.xlane.f32.xlu1 %v344_v58  ;;  %v1801_v58 = vld [vmem:[#allocation2 + $0x80] sm:$0xff] }
 0x167   :  { %v959_v19 = vmul.f32 0.5, %v958_v1  ;;  %1688 = vrsqrt.f32 %v2780_v16  ;;  %1581 = vst [vmem:[#allocation5 + $0x68] sm:$0xff] %v1517_v48  ;;  %v915_v25 = vsel %vm914_vm9, %v2740_v22, %v911_v61  ;;  %v623_v57 = vsub.f32 %v495_v54, %v2392_v5  ;;  %v1799_v5 = vld [vmem:[#allocation2 + $0x60] sm:$0xff]  ;;  %vm964_vm13 = vmor %vm962_vm8, %vm963_vm10  ;;  %v395_v61 = vpop.xlane.xlu0 %394 }
 0x168   :  { %v921_v11 = vmul.f32 %v2750_v36, %v920_v59  ;;  %v938_v37 = vmul.f32 %v2782_v38, %v937_v21  ;;  %v1448_v56 = vmul.f32 %v1797_v51, %v915_v25  ;;  %v621_v32 = vsub.f32 %v493_v46, %v2358_v23 }
 0x169   :  { %v960_v15 = vsub.f32 1.5, %v959_v19  ;;  %v494_v52 = vmul.f32 0.0078125, %v385_v8  ;;  %v687_v26 = vmax.f32 %v623_v57, 0.0  ;;  %v346_v31 = vmul.f32 %v1798_v27, %v1798_v27  ;;  %v1800_v8 = vld [vmem:[#allocation2 + $0x1f8] sm:$0xff]  ;;  %v3752_v27 = vld [vmem:[#allocation40_spill] sm:$0xff] }
 0x16a   :  { %v925_v6 = vsel %vm924_vm12, %v2750_v36, %v921_v11  ;;  %v939_v22 = vmul.f32 0.5, %v938_v37  ;;  %v1515_v17 = vmul.f32 %v2572_v4, %v1448_v56  ;;  %v685_v33 = vmax.f32 %v621_v32, 0.0 }
 0x16b   :  { %v1449_v63 = vmul.f32 %v1799_v5, %v925_v6  ;;  %v961_v60 = vmul.f32 %v2767_v42, %v960_v15  ;;  %v2814_v10 = vadd.f32 1e-05, %v687_v26  ;;  %v622_v36 = vsub.f32 %v494_v52, %v2394_v50 }
 0x16c   :  { %v940_v23 = vsub.f32 1.5, %v939_v22  ;;  %472 = vadd.xlane.f32.xlu0 %v346_v31  ;;  %v347_v14 = vmul.f32 %v1800_v8, %v1800_v8  ;;  %1579 = vst [vmem:[#allocation5 + $0x58] sm:$0xff] %v1515_v17  ;;  %v2821_v1 = vadd.f32 1e-05, %v685_v33  ;;  %v498_v18 = vmul.f32 0.0078125, %v393_v7 }
 0x16d   :  { %v2817_v47 = vpop.eup %1688  ;;  %v1516_v45 = vmul.f32 %v2572_v4, %v1449_v63  ;;  %v965_v24 = vsel %vm964_vm13, %v2767_v42, %v961_v60  ;;  %vm942_vm14 = vweird.f32 %v2744_v53  ;;  %v2829_v48 = vmul.f32 %v2511_v49, %v2511_v49  ;;  %v399_v53 = vpop.xlane.xlu2 %398 }
 0x16e   :  { %v1453_v54 = vmul.f32 %v1801_v58, %v965_v24  ;;  %v941_v46 = vmul.f32 %v2782_v38, %v940_v23  ;;  %v947_v50 = vmul.f32 %v2817_v47, %v2780_v16  ;;  %v2833_v42 = vmul.f32 %v2518_v13, %v2518_v13  ;;  %vm944_vm15 = vmor %vm942_vm14, %vm943_vm11  ;;  %474 = vadd.xlane.f32.xlu1 %v347_v14  ;;  %v1802_v13 = vld [vmem:[#allocation2 + $0x70] sm:$0xff] }
 0x16f   :  { %1580 = vst [vmem:[#allocation5 + $0x60] sm:$0xff] %v1516_v45  ;;  %1690 = vrsqrt.f32 %v2814_v10  ;;  %v686_v7 = vmax.f32 %v622_v36, 0.0  ;;  %v626_v11 = vsub.f32 %v498_v18, %v2398_v40  ;;  %v496_v37 = vmul.f32 0.0078125, %v2785_v20  ;;  %v3751_v40 = vld [vmem:[#allocation12_spill] sm:$0xff]  ;;  %v1803_v45 = vld [vmem:[#allocation2 + $0x78] sm:$0xff] }
 0x170   :  { %v1520_v59 = vmul.f32 %v2572_v4, %v1453_v54  ;;  %v945_v21 = vsel %vm944_vm15, %v2782_v38, %v941_v46  ;;  %v948_v49 = vmul.f32 %v2817_v47, %v947_v50  ;;  %1692 = vrsqrt.f32 %v2821_v1 }
 0x171   :  { %v1451_v19 = vmul.f32 %v1802_v13, %v945_v21  ;;  %v2842_v25 = vadd.f32 1e-05, %v686_v7  ;;  %v497_v51 = vmul.f32 0.0078125, %v391_v12  ;;  %v501_v56 = vmul.f32 0.0078125, %v399_v53 }
 0x172   :  { %1584 = vst [vmem:[#allocation5 + $0x80] sm:$0xff] %v1520_v59  ;;  %v949_v57 = vmul.f32 0.5, %v948_v49  ;;  %v499_v15 = vmul.f32 0.0078125, %v395_v61  ;;  %v2848_v38 = vmul.f32 %v2534_v44, %v2534_v44  ;;  %v690_v52 = vmax.f32 %v626_v11, 0.0 }
 0x173   :  { %v1518_v32 = vmul.f32 %v2572_v4, %v1451_v19  ;;  %1694 = vrsqrt.f32 %v2842_v25  ;;  %vm953_vm0 = vweird.f32 %v2817_v47  ;;  %v624_v22 = vsub.f32 %v496_v37, %v3751_v40 }
 0x174   :  { %v950_v6 = vsub.f32 1.5, %v949_v57  ;;  %v625_v20 = vsub.f32 %v497_v51, %v2400_v43  ;;  %v2858_v31 = vmul.f32 0.0078125, %v3752_v27  ;;  %v2860_v44 = vadd.f32 1e-05, %v690_v52  ;;  %v401_v52 = vpop.xlane.xlu0 %400 }
 0x175   :  { %v2855_v26 = vpop.eup %1690  ;;  %1582 = vst [vmem:[#allocation5 + $0x70] sm:$0xff] %v1518_v32  ;;  %v629_v17 = vsub.f32 %v501_v56, %v2404_v2  ;;  %v627_v5 = vsub.f32 %v499_v15, %v2396_v62  ;;  %vm952_vm1 = vweird.f32 %v2780_v16  ;;  %v688_v33 = vmax.f32 %v624_v22, 0.0  ;;  %v397_v62 = vpop.xlane.xlu1 %396  ;;  %v1804_v22 = vld [vmem:[#allocation2 + $0x98] sm:$0xff] }
 0x176   :  { %v2864_v63 = vpop.eup %1692  ;;  %v951_v60 = vmul.f32 %v2817_v47, %v950_v6  ;;  %v987_v43 = vmul.f32 %v2855_v26, %v2814_v10  ;;  %vm954_vm2 = vmor %vm952_vm1, %vm953_vm0  ;;  %vm992_vm3 = vweird.f32 %v2814_v10  ;;  %vm972_vm4 = vweird.f32 %v2821_v1  ;;  %v405_v50 = vpop.xlane.xlu2 %404 }
 0x177   :  { %v967_v23 = vmul.f32 %v2864_v63, %v2821_v1  ;;  %1696 = vrsqrt.f32 %v2860_v44  ;;  %v2877_v16 = vadd.f32 1e-05, %v688_v33  ;;  %v689_v8 = vmax.f32 %v625_v20, 0.0 }
 0x178   :  { %v955_v2 = vsel %vm954_vm2, %v2817_v47, %v951_v60  ;;  %v988_v36 = vmul.f32 %v2855_v26, %v987_v43  ;;  %v693_v12 = vmax.f32 %v629_v17, 0.0  ;;  %v691_v58 = vmax.f32 %v627_v5, 0.0  ;;  %v1805_v5 = vld [vmem:[#allocation2 + $0x88] sm:$0xff] }
 0x179   :  { %v2879_v14 = vpop.eup %1694  ;;  %v1452_v24 = vmul.f32 %v1803_v45, %v955_v2  ;;  %v968_v18 = vmul.f32 %v2864_v63, %v967_v23  ;;  %vm982_vm5 = vweird.f32 %v2842_v25  ;;  %1698 = vrsqrt.f32 %v2877_v16 }
 0x17a   :  { %v989_v54 = vmul.f32 0.5, %v988_v36  ;;  %v977_v46 = vmul.f32 %v2879_v14, %v2842_v25  ;;  %v500_v47 = vmul.f32 0.0078125, %v397_v62  ;;  %vm993_vm6 = vweird.f32 %v2855_v26  ;;  %v1806_v25 = vld [vmem:[#allocation2 + $0x90] sm:$0xff] }
 0x17b   :  { %v1519_v7 = vmul.f32 %v2572_v4, %v1452_v24  ;;  %v969_v53 = vmul.f32 0.5, %v968_v18  ;;  %v2888_v61 = vadd.f32 1e-05, %v689_v8  ;;  %v2891_v49 = vadd.f32 1e-05, %v693_v12  ;;  %vm994_vm8 = vmor %vm992_vm3, %vm993_vm6 }
 0x17c   :  { %v990_v59 = vsub.f32 1.5, %v989_v54  ;;  %v978_v21 = vmul.f32 %v2879_v14, %v977_v46  ;;  %v2893_v13 = vadd.f32 1e-05, %v691_v58  ;;  %vm973_vm7 = vweird.f32 %v2864_v63 }
 0x17d   :  { %v2895_v19 = vpop.eup %1696  ;;  %1583 = vst [vmem:[#allocation5 + $0x78] sm:$0xff] %v1519_v7  ;;  %v970_v11 = vsub.f32 1.5, %v969_v53  ;;  %1700 = vrsqrt.f32 %v2888_v61  ;;  %v2899_v37 = vmul.f32 0.0078125, %v405_v50  ;;  %v628_v15 = vsub.f32 %v500_v47, %v2406_v3  ;;  %vm974_vm11 = vmor %vm972_vm4, %vm973_vm7 }
 0x17e   :  { %v991_v57 = vmul.f32 %v2855_v26, %v990_v59  ;;  %v979_v51 = vmul.f32 0.5, %v978_v21  ;;  %v1017_v56 = vmul.f32 %v2895_v19, %v2860_v44  ;;  %vm983_vm9 = vweird.f32 %v2879_v14 }
 0x17f   :  { %v971_v32 = vmul.f32 %v2864_v63, %v970_v11  ;;  %vm1022_vm10 = vweird.f32 %v2860_v44  ;;  %1702 = vrsqrt.f32 %v2891_v49  ;;  %v2913_v6 = vpop.eup %1698  ;;  %vm1002_vm12 = vweird.f32 %v2877_v16  ;;  %vm984_vm13 = vmor %vm982_vm5, %vm983_vm9 }
 0x180   :  { %v995_v40 = vsel %vm994_vm8, %v2855_v26, %v991_v57  ;;  %v980_v3 = vsub.f32 1.5, %v979_v51  ;;  %v1018_v10 = vmul.f32 %v2895_v19, %v1017_v56  ;;  %1704 = vrsqrt.f32 %v2893_v13  ;;  %v403_v26 = vpop.xlane.xlu1 %402  ;;  %v1807_v57 = vld [vmem:[#allocation2 + $0xb0] sm:$0xff] }
 0x181   :  { %v1456_v20 = vmul.f32 %v1804_v22, %v995_v40  ;;  %v975_v27 = vsel %vm974_vm11, %v2864_v63, %v971_v32  ;;  %v997_v17 = vmul.f32 %v2913_v6, %v2877_v16  ;;  %v692_v33 = vmax.f32 %v628_v15, 0.0  ;;  %v411_v15 = vpop.xlane.xlu2 %410  ;;  %v407_v32 = vpop.xlane.xlu0 %406 }
 0x182   :  { %v1454_v60 = vmul.f32 %v1805_v5, %v975_v27  ;;  %v981_v1 = vmul.f32 %v2879_v14, %v980_v3  ;;  %v1019_v43 = vmul.f32 0.5, %v1018_v10  ;;  %vm1023_vm14 = vweird.f32 %v2895_v19  ;;  %v1808_v5 = vld [vmem:[#allocation2 + $0xa0] sm:$0xff] }
 0x183   :  { %v2927_v23 = vpop.eup %1700  ;;  %v1523_v62 = vmul.f32 %v2572_v4, %v1456_v20  ;;  %v998_v63 = vmul.f32 %v2913_v6, %v997_v17  ;;  %vm1003_vm15 = vweird.f32 %v2913_v6  ;;  %vm1012_vm0 = vweird.f32 %v2888_v61  ;;  %vm1024_vm2 = vmor %vm1022_vm10, %vm1023_vm14 }
 0x184   :  { %v1521_v2 = vmul.f32 %v2572_v4, %v1454_v60  ;;  %v985_v36 = vsel %vm984_vm13, %v2879_v14, %v981_v1  ;;  %v1020_v8 = vsub.f32 1.5, %v1019_v43  ;;  %v1007_v45 = vmul.f32 %v2927_v23, %v2888_v61  ;;  %vm1004_vm6 = vmor %vm1002_vm12, %vm1003_vm15 }
 0x185   :  { %v2942_v24 = vpop.eup %1702  ;;  %1587 = vst [vmem:[#allocation5 + $0x98] sm:$0xff] %v1523_v62  ;;  %v1455_v18 = vmul.f32 %v1806_v25, %v985_v36  ;;  %v999_v12 = vmul.f32 0.5, %v998_v63  ;;  %v2944_v58 = vadd.f32 1e-05, %v692_v33  ;;  %v632_v54 = vsub.f32 %v2899_v37, %v2410_v29  ;;  %v1809_v36 = vld [vmem:[#allocation2 + $0xa8] sm:$0xff] }
 0x186   :  { %v2948_v46 = vpop.eup %1704  ;;  %1585 = vst [vmem:[#allocation5 + $0x88] sm:$0xff] %v1521_v2  ;;  %v1021_v14 = vmul.f32 %v2895_v19, %v1020_v8  ;;  %v1008_v47 = vmul.f32 %v2927_v23, %v1007_v45  ;;  %v1047_v50 = vmul.f32 %v2942_v24, %v2891_v49  ;;  %vm1052_vm1 = vweird.f32 %v2891_v49  ;;  %v3753_v25 = vld [vmem:[#allocation41_spill] sm:$0xff] }
 0x187   :  { %v502_v7 = vmul.f32 0.0078125, %v401_v52  ;;  %v1522_v53 = vmul.f32 %v2572_v4, %v1455_v18  ;;  %v1000_v29 = vsub.f32 1.5, %v999_v12  ;;  %vm1013_vm3 = vweird.f32 %v2927_v23 }
 0x188   :  { %v1027_v59 = vmul.f32 %v2948_v46, %v2893_v13  ;;  %vm1032_vm4 = vweird.f32 %v2893_v13  ;;  %v1025_v21 = vsel %vm1024_vm2, %v2895_v19, %v1021_v14  ;;  %v1009_v11 = vmul.f32 0.5, %v1008_v47  ;;  %v409_v17 = vpop.xlane.xlu1 %408  ;;  %vm1014_vm7 = vmor %vm1012_vm0, %vm1013_vm3  ;;  %v1810_v14 = vld [vmem:[#allocation2 + $0xc8] sm:$0xff] }
 0x189   :  { %v1048_v37 = vmul.f32 %v2942_v24, %v1047_v50  ;;  %1706 = vrsqrt.f32 %v2944_v58  ;;  %1586 = vst [vmem:[#allocation5 + $0x90] sm:$0xff] %v1522_v53  ;;  %v1459_v51 = vmul.f32 %v1807_v57, %v1025_v21  ;;  %v1001_v44 = vmul.f32 %v2913_v6, %v1000_v29  ;;  %v3754_v53 = vld [vmem:[#allocation42_spill] sm:$0xff] }
 0x18a   :  { %vm1053_vm5 = vweird.f32 %v2942_v24  ;;  %v1028_v56 = vmul.f32 %v2948_v46, %v1027_v59  ;;  %v1010_v19 = vsub.f32 1.5, %v1009_v11  ;;  %v696_v40 = vmax.f32 %v632_v54, 0.0 }
 0x18b   :  { %v1049_v52 = vmul.f32 0.5, %v1048_v37  ;;  %v630_v3 = vsub.f32 %v502_v7, %v2402_v39  ;;  %v1526_v10 = vmul.f32 %v2572_v4, %v1459_v51  ;;  %v1005_v22 = vsel %vm1004_vm6, %v2913_v6, %v1001_v44  ;;  %vm1054_vm9 = vmor %vm1052_vm1, %vm1053_vm5  ;;  %v417_v51 = vpop.xlane.xlu2 %416 }
 0x18c   :  { %v1029_v20 = vmul.f32 0.5, %v1028_v56  ;;  %v503_v27 = vmul.f32 0.0078125, %v403_v26  ;;  %v1457_v60 = vmul.f32 %v1808_v5, %v1005_v22  ;;  %v1011_v1 = vmul.f32 %v2927_v23, %v1010_v19 }
 0x18d   :  { %v1050_v43 = vsub.f32 1.5, %v1049_v52  ;;  %v2978_v33 = vadd.f32 1e-05, %v696_v40  ;;  %1590 = vst [vmem:[#allocation5 + $0xb0] sm:$0xff] %v1526_v10  ;;  %vm1033_vm8 = vweird.f32 %v2948_v46  ;;  %v694_v16 = vmax.f32 %v630_v3, 0.0 }
 0x18e   :  { %v1030_v39 = vsub.f32 1.5, %v1029_v20  ;;  %v631_v6 = vsub.f32 %v503_v27, %v2412_v41  ;;  %v1524_v62 = vmul.f32 %v2572_v4, %v1457_v60  ;;  %v1015_v63 = vsel %vm1014_vm7, %v2927_v23, %v1011_v1  ;;  %vm1034_vm10 = vmor %vm1032_vm4, %vm1033_vm8 }
 0x18f   :  { %v2986_v26 = vpop.eup %1706  ;;  %v1051_v2 = vmul.f32 %v2942_v24, %v1050_v43  ;;  %1708 = vrsqrt.f32 %v2978_v33  ;;  %v1458_v8 = vmul.f32 %v1809_v36, %v1015_v63  ;;  %v507_v45 = vmul.f32 0.0078125, %v411_v15  ;;  %v3755_v36 = vld [vmem:[#allocation10_spill] sm:$0xff] }
 0x190   :  { %v1031_v61 = vmul.f32 %v2948_v46, %v1030_v39  ;;  %v1037_v41 = vmul.f32 %v2986_v26, %v2944_v58  ;;  %v278_v18 = vmul.f32 0.0078125, %v3753_v25  ;;  %1588 = vst [vmem:[#allocation5 + $0xa0] sm:$0xff] %v1524_v62  ;;  %v3005_v12 = vadd.f32 1e-05, %v694_v16  ;;  %v1812_v62 = vld [vmem:[#allocation2 + $0xc0] sm:$0xff] }
 0x191   :  { %v1055_v23 = vsel %vm1054_vm9, %v2942_v24, %v1051_v2  ;;  %v695_v49 = vmax.f32 %v631_v6, 0.0  ;;  %v1525_v54 = vmul.f32 %v2572_v4, %v1458_v8  ;;  %v3011_v29 = vmul.f32 0.0078125, %v3754_v53  ;;  %v1811_v24 = vld [vmem:[#allocation2 + $0xb8] sm:$0xff]  ;;  %v1813_v53 = vld [vmem:[#allocation2 + $0xe0] sm:$0xff] }
 0x192   :  { %v1462_v47 = vmul.f32 %v1810_v14, %v1055_v23  ;;  %v1035_v50 = vsel %vm1034_vm10, %v2948_v46, %v1031_v61  ;;  %v1038_v7 = vmul.f32 %v2986_v26, %v1037_v41  ;;  %1710 = vrsqrt.f32 %v3005_v12  ;;  %v413_v46 = vpop.xlane.xlu0 %412 }
 0x193   :  { %v1460_v59 = vmul.f32 %v1811_v24, %v1035_v50  ;;  %v3014_v13 = vadd.f32 1e-05, %v695_v49  ;;  %1589 = vst [vmem:[#allocation5 + $0xa8] sm:$0xff] %v1525_v54  ;;  %v635_v37 = vsub.f32 %v507_v45, %v2416_v34  ;;  %v505_v57 = vmul.f32 0.0078125, %v407_v32  ;;  %v415_v32 = vpop.xlane.xlu1 %414 }
 0x194   :  { %v1529_v21 = vmul.f32 %v2572_v4, %v1462_v47  ;;  %v1039_v11 = vmul.f32 0.5, %v1038_v7  ;;  %v3020_v56 = vmul.f32 %v2858_v31, %v2858_v31  ;;  %v506_v19 = vmul.f32 0.0078125, %v409_v17 }
 0x195   :  { %v1709_v44 = vpop.eup %1708  ;;  %v1527_v15 = vmul.f32 %v2572_v4, %v1460_v59  ;;  %1712 = vrsqrt.f32 %v3014_v13  ;;  %vm1043_vm11 = vweird.f32 %v2986_v26  ;;  %v699_v34 = vmax.f32 %v635_v37, 0.0 }
 0x196   :  { %1593 = vst [vmem:[#allocation5 + $0xc8] sm:$0xff] %v1529_v21  ;;  %v1040_v52 = vsub.f32 1.5, %v1039_v11  ;;  %v1077_v40 = vmul.f32 %v1709_v44, %v2978_v33  ;;  %v633_v3 = vsub.f32 %v505_v57, %v2408_v0  ;;  %v634_v10 = vsub.f32 %v506_v19, %v2418_v35  ;;  %v423_v57 = vpop.xlane.xlu2 %422 }
 0x197   :  { %1591 = vst [vmem:[#allocation5 + $0xb8] sm:$0xff] %v1527_v15  ;;  %v510_v31 = vmul.f32 0.0078125, %v417_v51  ;;  %v508_v22 = vmul.f32 0.0078125, %v413_v46  ;;  %vm1042_vm12 = vweird.f32 %v2944_v58  ;;  %v3030_v17 = vadd.f32 1e-05, %v699_v34 }
 0x198   :  { %v1041_v20 = vmul.f32 %v2986_v26, %v1040_v52  ;;  %v1078_v27 = vmul.f32 %v1709_v44, %v1077_v40  ;;  %v3032_v5 = vpop.eup %1710  ;;  %v3034_v60 = vmul.f32 %v278_v18, %v278_v18  ;;  %vm1044_vm13 = vmor %vm1042_vm12, %vm1043_vm11  ;;  %v697_v1 = vmax.f32 %v633_v3, 0.0  ;;  %v3076_v46 = vld [vmem:[%s3636_s1] ss:$0 sm:$0xff] }
 0x199   :  { %v698_v0 = vmax.f32 %v634_v10, 0.0  ;;  %v509_v43 = vmul.f32 0.0078125, %v415_v32  ;;  %v1057_v16 = vmul.f32 %v3032_v5, %v3005_v12  ;;  %v638_v58 = vsub.f32 %v510_v31, %v2441_v28 }
 0x19a   :  { %v1045_v35 = vsel %vm1044_vm13, %v2986_v26, %v1041_v20  ;;  %v1079_v39 = vmul.f32 0.5, %v1078_v27  ;;  %1714 = vrsqrt.f32 %v3030_v17  ;;  %v3045_v2 = vadd.f32 1e-05, %v697_v1 }
 0x19b   :  { %v3042_v6 = vpop.eup %1712  ;;  %v1461_v63 = vmul.f32 %v1812_v62, %v1045_v35  ;;  %v636_v8 = vsub.f32 %v508_v22, %v3755_v36  ;;  %vm1083_vm14 = vweird.f32 %v1709_v44  ;;  %v1058_v26 = vmul.f32 %v3032_v5, %v1057_v16 }
 0x19c   :  { %v1080_v61 = vsub.f32 1.5, %v1079_v39  ;;  %v1067_v41 = vmul.f32 %v3042_v6, %v3014_v13  ;;  %vm1082_vm15 = vweird.f32 %v2978_v33  ;;  %1716 = vrsqrt.f32 %v3045_v2 }
 0x19d   :  { %v1528_v45 = vmul.f32 %v2572_v4, %v1461_v63  ;;  %v3054_v28 = vadd.f32 1e-05, %v698_v0  ;;  %v1059_v18 = vmul.f32 0.5, %v1058_v26  ;;  %v702_v49 = vmax.f32 %v638_v58, 0.0  ;;  %vm1084_vm0 = vmor %vm1082_vm15, %vm1083_vm14  ;;  %v1816_v0 = vld [vmem:[#allocation2 + $0xd8] sm:$0xff] }
 0x19e   :  { %v1081_v25 = vmul.f32 %v1709_v44, %v1080_v61  ;;  %v1068_v23 = vmul.f32 %v3042_v6, %v1067_v41  ;;  %vm1063_vm1 = vweird.f32 %v3032_v5  ;;  %v700_v54 = vmax.f32 %v636_v8, 0.0 }
 0x19f   :  { %1592 = vst [vmem:[#allocation5 + $0xc0] sm:$0xff] %v1528_v45  ;;  %1718 = vrsqrt.f32 %v3054_v28  ;;  %v637_v4 = vsub.f32 %v509_v43, %v2443_v55  ;;  %v1060_v33 = vsub.f32 1.5, %v1059_v18  ;;  %v3060_v50 = vadd.f32 1e-05, %v702_v49 }
 0x1a0   :  { %v1085_v14 = vsel %vm1084_vm0, %v1709_v44, %v1081_v25  ;;  %v1069_v47 = vmul.f32 0.5, %v1068_v23  ;;  %v3062_v7 = vpop.eup %1714  ;;  %vm1062_vm2 = vweird.f32 %v3005_v12  ;;  %v3065_v59 = vadd.f32 1e-05, %v700_v54  ;;  %v419_v44 = vpop.xlane.xlu0 %418  ;;  %v3756_v25 = vld [vmem:[#allocation15_spill] sm:$0xff] }
 0x1a1   :  { %v1465_v24 = vmul.f32 %v1813_v53, %v1085_v14  ;;  %v701_v21 = vmax.f32 %v637_v4, 0.0  ;;  %v1061_v11 = vmul.f32 %v3032_v5, %v1060_v33  ;;  %vm1073_vm3 = vweird.f32 %v3042_v6  ;;  %vm1064_vm4 = vmor %vm1062_vm2, %vm1063_vm1  ;;  %v1817_v33 = vld [vmem:[#allocation2 + $0xf8] sm:$0xff] }
 0x1a2   :  { %v1070_v37 = vsub.f32 1.5, %v1069_v47  ;;  %v1107_v55 = vmul.f32 %v3062_v7, %v3030_v17  ;;  %v3071_v51 = vpop.eup %1716  ;;  %vm1072_vm5 = vweird.f32 %v3014_v13  ;;  %vm1112_vm6 = vweird.f32 %v3030_v17  ;;  %v1815_v13 = vld [vmem:[#allocation2 + $0xd0] sm:$0xff] }
 0x1a3   :  { %v1532_v12 = vmul.f32 %v3076_v46, %v1465_v24  ;;  %1720 = vrsqrt.f32 %v3060_v50  ;;  %v1065_v15 = vsel %vm1064_vm4, %v3032_v5, %v1061_v11  ;;  %v1087_v40 = vmul.f32 %v3071_v51, %v3045_v2  ;;  %vm1074_vm8 = vmor %vm1072_vm5, %vm1073_vm3  ;;  %v421_v5 = vpop.xlane.xlu1 %420  ;;  %v429_v24 = vpop.xlane.xlu2 %428 }
 0x1a4   :  { %v1071_v19 = vmul.f32 %v3042_v6, %v1070_v37  ;;  %v1108_v52 = vmul.f32 %v3062_v7, %v1107_v55  ;;  %vm1092_vm7 = vweird.f32 %v3045_v2  ;;  %v1463_v32 = vmul.f32 %v1815_v13, %v1065_v15 }
 0x1a5   :  { %v3090_v34 = vpop.eup %1718  ;;  %1596 = vst [vmem:[#allocation5 + $0xe0] sm:$0xff] %v1532_v12  ;;  %1722 = vrsqrt.f32 %v3065_v59  ;;  %v3095_v3 = vadd.f32 1e-05, %v701_v21  ;;  %v513_v10 = vmul.f32 0.0078125, %v423_v57  ;;  %v1088_v20 = vmul.f32 %v3071_v51, %v1087_v40  ;;  %v1818_v12 = vld [vmem:[#allocation2 + $0xe8] sm:$0xff]  ;;  %v1819_v40 = vld [vmem:[#allocation2 + $0xf0] sm:$0xff] }
 0x1a6   :  { %v1075_v31 = vsel %vm1074_vm8, %v3042_v6, %v1071_v19  ;;  %v1109_v22 = vmul.f32 0.5, %v1108_v52  ;;  %v1097_v27 = vmul.f32 %v3090_v34, %v3054_v28  ;;  %vm1102_vm9 = vweird.f32 %v3054_v28 }
 0x1a7   :  { %v1530_v1 = vmul.f32 %v3076_v46, %v1463_v32  ;;  %v1464_v43 = vmul.f32 %v1816_v0, %v1075_v31  ;;  %vm1113_vm10 = vweird.f32 %v3062_v7  ;;  %1724 = vrsqrt.f32 %v3095_v3 }
 0x1a8   :  { %v1110_v35 = vsub.f32 1.5, %v1109_v22  ;;  %v1089_v39 = vmul.f32 0.5, %v1088_v20  ;;  %vm1093_vm11 = vweird.f32 %v3071_v51  ;;  %v1098_v16 = vmul.f32 %v3090_v34, %v1097_v27  ;;  %vm1114_vm13 = vmor %vm1112_vm6, %vm1113_vm10  ;;  %v425_v21 = vpop.xlane.xlu0 %424 }
 0x1a9   :  { %v3107_v58 = vpop.eup %1720  ;;  %1594 = vst [vmem:[#allocation5 + $0xd0] sm:$0xff] %v1530_v1  ;;  %v1531_v6 = vmul.f32 %v3076_v46, %v1464_v43  ;;  %v641_v62 = vsub.f32 %v513_v10, %v2449_v9  ;;  %v511_v63 = vmul.f32 0.0078125, %v419_v44  ;;  %v512_v36 = vmul.f32 0.0078125, %v421_v5  ;;  %vm1094_vm0 = vmor %vm1092_vm7, %vm1093_vm11 }
 0x1aa   :  { %v1111_v8 = vmul.f32 %v3062_v7, %v1110_v35  ;;  %v1090_v61 = vsub.f32 1.5, %v1089_v39  ;;  %v1099_v26 = vmul.f32 0.5, %v1098_v16  ;;  %v1137_v41 = vmul.f32 %v3107_v58, %v3060_v50  ;;  %v1820_v39 = vld [vmem:[#allocation2 + $0x110] sm:$0xff] }
 0x1ab   :  { %vm1142_vm12 = vweird.f32 %v3060_v50  ;;  %v3115_v45 = vpop.eup %1722  ;;  %1595 = vst [vmem:[#allocation5 + $0xd8] sm:$0xff] %v1531_v6  ;;  %vm1103_vm14 = vweird.f32 %v3090_v34  ;;  %vm1143_vm15 = vweird.f32 %v3107_v58  ;;  %v705_v9 = vmax.f32 %v641_v62, 0.0  ;;  %v3757_v62 = vld [vmem:[#allocation18_spill] sm:$0xff] }
 0x1ac   :  { %v639_v18 = vsub.f32 %v511_v63, %v3756_v25  ;;  %v1115_v23 = vsel %vm1114_vm13, %v3062_v7, %v1111_v8  ;;  %v1091_v49 = vmul.f32 %v3071_v51, %v1090_v61  ;;  %v1100_v54 = vsub.f32 1.5, %v1099_v26  ;;  %vm1104_vm2 = vmor %vm1102_vm9, %vm1103_vm14  ;;  %v427_v8 = vpop.xlane.xlu1 %426 }
 0x1ad   :  { %v1138_v4 = vmul.f32 %v3107_v58, %v1137_v41  ;;  %v3127_v14 = vpop.eup %1724  ;;  %v1468_v47 = vmul.f32 %v1817_v33, %v1115_v23  ;;  %v1117_v17 = vmul.f32 %v3115_v45, %v3065_v59  ;;  %vm1122_vm1 = vweird.f32 %v3065_v59  ;;  %vm1144_vm5 = vmor %vm1142_vm12, %vm1143_vm15  ;;  %v3759_v41 = vld [vmem:[#allocation13_spill] sm:$0xff]  ;;  %v435_v59 = vpop.xlane.xlu2 %434 }
 0x1ae   :  { %v3136_v7 = vadd.f32 1e-05, %v705_v9  ;;  %v640_v53 = vsub.f32 %v512_v36, %v2451_v30  ;;  %v1095_v11 = vsel %vm1094_vm0, %v3071_v51, %v1091_v49  ;;  %v1101_v37 = vmul.f32 %v3090_v34, %v1100_v54  ;;  %v3758_v36 = vld [vmem:[#allocation16_spill] sm:$0xff]  ;;  %v1822_v33 = vld [vmem:[#allocation2 + $0x108] sm:$0xff] }
 0x1af   :  { %v1139_v55 = vmul.f32 0.5, %v1138_v4  ;;  %v1127_v2 = vmul.f32 %v3127_v14, %v3095_v3  ;;  %v1535_v57 = vmul.f32 %v3076_v46, %v1468_v47  ;;  %v1466_v44 = vmul.f32 %v1818_v12, %v1095_v11  ;;  %v1821_v49 = vld [vmem:[#allocation2 + $0x100] sm:$0xff] }
 0x1b0   :  { %v1118_v30 = vmul.f32 %v3115_v45, %v1117_v17  ;;  %vm1123_vm3 = vweird.f32 %v3115_v45  ;;  %v1105_v51 = vsel %vm1104_vm2, %v3090_v34, %v1101_v37  ;;  %1726 = vrsqrt.f32 %v3136_v7  ;;  %v431_v23 = vpop.xlane.xlu0 %430 }
 0x1b1   :  { %v1140_v15 = vsub.f32 1.5, %v1139_v55  ;;  %v1128_v19 = vmul.f32 %v3127_v14, %v1127_v2  ;;  %1599 = vst [vmem:[#allocation5 + $0xf8] sm:$0xff] %v1535_v57  ;;  %v1533_v52 = vmul.f32 %v3076_v46, %v1466_v44  ;;  %v1467_v13 = vmul.f32 %v1819_v40, %v1105_v51  ;;  %vm1124_vm6 = vmor %vm1122_vm1, %vm1123_vm3  ;;  %v3760_v57 = vld [vmem:[#allocation19_spill] sm:$0xff] }
 0x1b2   :  { %v1119_v32 = vmul.f32 0.5, %v1118_v30  ;;  %vm1133_vm4 = vweird.f32 %v3127_v14  ;;  %v703_v31 = vmax.f32 %v639_v18, 0.0  ;;  %v704_v22 = vmax.f32 %v640_v53, 0.0  ;;  %v3761_v30 = vld [vmem:[#allocation31_spill] sm:$0xff] }
 0x1b3   :  { %v1141_v28 = vmul.f32 %v3107_v58, %v1140_v15  ;;  %v1129_v10 = vmul.f32 0.5, %v1128_v19  ;;  %1597 = vst [vmem:[#allocation5 + $0xe8] sm:$0xff] %v1533_v52  ;;  %v1534_v34 = vmul.f32 %v3076_v46, %v1467_v13  ;;  %v516_v27 = vmul.f32 0.0078125, %v429_v24  ;;  %v3762_v15 = vld [vmem:[#allocation43_spill] sm:$0xff] }
 0x1b4   :  { %v1120_v20 = vsub.f32 1.5, %v1119_v32  ;;  %v514_v5 = vmul.f32 0.0078125, %v425_v21  ;;  %v3162_v43 = vadd.f32 1e-05, %v703_v31  ;;  %v3164_v35 = vadd.f32 1e-05, %v704_v22 }
 0x1b5   :  { %v1145_v1 = vsel %vm1144_vm5, %v3107_v58, %v1141_v28  ;;  %v1130_v0 = vsub.f32 1.5, %v1129_v10  ;;  %1598 = vst [vmem:[#allocation5 + $0xf0] sm:$0xff] %v1534_v34  ;;  %v644_v63 = vsub.f32 %v516_v27, %v3757_v62  ;;  %v3173_v58 = vmul.f32 %v3011_v29, %v3011_v29  ;;  %v3763_v52 = vld [vmem:[#allocation11_spill] sm:$0xff]  ;;  %v3764_v10 = vld [vmem:[#allocation32_spill] sm:$0xff] }
 0x1b6   :  { %v1471_v16 = vmul.f32 %v1820_v39, %v1145_v1  ;;  %v1121_v6 = vmul.f32 %v3115_v45, %v1120_v20  ;;  %v642_v50 = vsub.f32 %v514_v5, %v3758_v36  ;;  %v3169_v61 = vpop.eup %1726  ;;  %vm1132_vm7 = vweird.f32 %v3095_v3 }
 0x1b7   :  { %v1131_v26 = vmul.f32 %v3127_v14, %v1130_v0  ;;  %1728 = vrsqrt.f32 %v3162_v43  ;;  %v282_v9 = vmul.f32 0.0078125, %v3759_v41  ;;  %vm1134_vm8 = vmor %vm1132_vm7, %vm1133_vm4  ;;  %v1167_v29 = vmul.f32 %v3169_v61, %v3136_v7  ;;  %v433_v0 = vpop.xlane.xlu1 %432 }
 0x1b8   :  { %v1538_v25 = vmul.f32 %v3076_v46, %v1471_v16  ;;  %v1125_v18 = vsel %vm1124_vm6, %v3115_v45, %v1121_v6  ;;  %1730 = vrsqrt.f32 %v3164_v35  ;;  %v708_v4 = vmax.f32 %v644_v63, 0.0 }
 0x1b9   :  { %v1469_v54 = vmul.f32 %v1821_v49, %v1125_v18  ;;  %v1135_v3 = vsel %vm1134_vm8, %v3127_v14, %v1131_v26  ;;  %v1168_v45 = vmul.f32 %v3169_v61, %v1167_v29  ;;  %v706_v17 = vmax.f32 %v642_v50, 0.0  ;;  %v441_v29 = vpop.xlane.xlu2 %440  ;;  %v437_v49 = vpop.xlane.xlu0 %436 }
 0x1ba   :  { %1602 = vst [vmem:[#allocation5 + $0x110] sm:$0xff] %v1538_v25  ;;  %v1470_v47 = vmul.f32 %v1822_v33, %v1135_v3  ;;  %v515_v53 = vmul.f32 0.0078125, %v427_v8  ;;  %v3193_v21 = vadd.f32 1e-05, %v708_v4  ;;  %v519_v11 = vmul.f32 0.0078125, %v435_v59  ;;  %v1823_v8 = vld [vmem:[#allocation2 + $0x128] sm:$0xff] }
 0x1bb   :  { %v1536_v24 = vmul.f32 %v3076_v46, %v1469_v54  ;;  %v517_v37 = vmul.f32 0.0078125, %v431_v23  ;;  %v1169_v2 = vmul.f32 0.5, %v1168_v45  ;;  %v3196_v14 = vadd.f32 1e-05, %v706_v17 }
 0x1bc   :  { %v1537_v55 = vmul.f32 %v3076_v46, %v1470_v47  ;;  %v643_v12 = vsub.f32 %v515_v53, %v3760_v57  ;;  %v3202_v51 = vmul.f32 0.0078125, %v3761_v30  ;;  %1732 = vrsqrt.f32 %v3193_v21  ;;  %v3765_v47 = vld [vmem:[#allocation21_spill] sm:$0xff] }
 0x1bd   :  { %v3199_v44 = vpop.eup %1728  ;;  %1600 = vst [vmem:[#allocation5 + $0x100] sm:$0xff] %v1536_v24  ;;  %v647_v19 = vsub.f32 %v519_v11, %v3762_v15  ;;  %v645_v40 = vsub.f32 %v517_v37, %v3763_v52  ;;  %v1170_v13 = vsub.f32 1.5, %v1169_v2  ;;  %vm1173_vm9 = vweird.f32 %v3169_v61 }
 0x1be   :  { %1601 = vst [vmem:[#allocation5 + $0x108] sm:$0xff] %v1537_v55  ;;  %v1147_v32 = vmul.f32 %v3199_v44, %v3162_v43  ;;  %1734 = vrsqrt.f32 %v3196_v14  ;;  %v3211_v28 = vpop.eup %1730  ;;  %v3214_v31 = vmul.f32 0.0078125, %v3764_v10  ;;  %v707_v22 = vmax.f32 %v643_v12, 0.0  ;;  %v1824_v55 = vld [vmem:[#allocation2 + $0x118] sm:$0xff] }
 0x1bf   :  { %v711_v34 = vmax.f32 %v647_v19, 0.0  ;;  %v709_v20 = vmax.f32 %v645_v40, 0.0  ;;  %v1171_v27 = vmul.f32 %v3169_v61, %v1170_v13  ;;  %vm1172_vm10 = vweird.f32 %v3136_v7  ;;  %v3766_v19 = vld [vmem:[#allocation17_spill] sm:$0xff] }
 0x1c0   :  { %v1148_v5 = vmul.f32 %v3199_v44, %v1147_v32  ;;  %v1157_v1 = vmul.f32 %v3211_v28, %v3164_v35  ;;  %v3221_v39 = vmul.f32 %v282_v9, %v282_v9  ;;  %vm1174_vm11 = vmor %vm1172_vm10, %vm1173_vm9  ;;  %vm1152_vm12 = vweird.f32 %v3162_v43  ;;  %v1825_v32 = vld [vmem:[#allocation2 + $0x120] sm:$0xff] }
 0x1c1   :  { %v3224_v16 = vadd.f32 1e-05, %v707_v22  ;;  %v3226_v6 = vadd.f32 1e-05, %v711_v34  ;;  %v1175_v62 = vsel %vm1174_vm11, %v3169_v61, %v1171_v27  ;;  %v3230_v36 = vadd.f32 1e-05, %v709_v20 }
 0x1c2   :  { %v1149_v63 = vmul.f32 0.5, %v1148_v5  ;;  %v1158_v7 = vmul.f32 %v3211_v28, %v1157_v1  ;;  %v3232_v50 = vpop.eup %1732  ;;  %v1474_v26 = vmul.f32 %v1823_v8, %v1175_v62  ;;  %vm1162_vm13 = vweird.f32 %v3164_v35  ;;  %v439_v62 = vpop.xlane.xlu1 %438 }
 0x1c3   :  { %1736 = vrsqrt.f32 %v3224_v16  ;;  %v518_v41 = vmul.f32 0.0078125, %v433_v0  ;;  %vm1153_vm14 = vweird.f32 %v3199_v44  ;;  %v1197_v18 = vmul.f32 %v3232_v50, %v3193_v21 }
 0x1c4   :  { %v3236_v9 = vpop.eup %1734  ;;  %v1150_v25 = vsub.f32 1.5, %v1149_v63  ;;  %v1159_v61 = vmul.f32 0.5, %v1158_v7  ;;  %vm1202_vm15 = vweird.f32 %v3193_v21  ;;  %v1541_v59 = vmul.f32 %v3076_v46, %v1474_v26  ;;  %vm1154_vm2 = vmor %vm1152_vm12, %vm1153_vm14  ;;  %v1826_v21 = vld [vmem:[#allocation2 + $0x140] sm:$0xff] }
 0x1c5   :  { %vm1163_vm0 = vweird.f32 %v3211_v28  ;;  %v1177_v23 = vmul.f32 %v3236_v9, %v3196_v14  ;;  %vm1182_vm1 = vweird.f32 %v3196_v14  ;;  %1738 = vrsqrt.f32 %v3226_v6 }
 0x1c6   :  { %v1151_v54 = vmul.f32 %v3199_v44, %v1150_v25  ;;  %v1160_v3 = vsub.f32 1.5, %v1159_v61  ;;  %v1198_v4 = vmul.f32 %v3232_v50, %v1197_v18  ;;  %1740 = vrsqrt.f32 %v3230_v36  ;;  %1605 = vst [vmem:[#allocation5 + $0x128] sm:$0xff] %v1541_v59  ;;  %vm1164_vm5 = vmor %vm1162_vm13, %vm1163_vm0  ;;  %v443_v61 = vpop.xlane.xlu0 %442  ;;  %v1827_v18 = vld [vmem:[#allocation2 + $0x130] sm:$0xff] }
 0x1c7   :  { %vm1203_vm3 = vweird.f32 %v3232_v50  ;;  %v1178_v33 = vmul.f32 %v3236_v9, %v1177_v23  ;;  %v646_v45 = vsub.f32 %v518_v41, %v3765_v47  ;;  %v522_v17 = vmul.f32 0.0078125, %v441_v29 }
 0x1c8   :  { %v1155_v53 = vsel %vm1154_vm2, %v3199_v44, %v1151_v54  ;;  %v1161_v24 = vmul.f32 %v3211_v28, %v1160_v3  ;;  %v1199_v11 = vmul.f32 0.5, %v1198_v4  ;;  %vm1183_vm4 = vweird.f32 %v3236_v9  ;;  %vm1204_vm8 = vmor %vm1202_vm15, %vm1203_vm3  ;;  %v3767_v3 = vld [vmem:[#allocation14_spill] sm:$0xff] }
 0x1c9   :  { %v3261_v37 = vpop.eup %1736  ;;  %v1472_v2 = vmul.f32 %v1824_v55, %v1155_v53  ;;  %v1179_v43 = vmul.f32 0.5, %v1178_v33  ;;  %v710_v57 = vmax.f32 %v646_v45, 0.0  ;;  %v520_v12 = vmul.f32 0.0078125, %v437_v49  ;;  %vm1184_vm10 = vmor %vm1182_vm1, %vm1183_vm4 }
 0x1ca   :  { %v1165_v30 = vsel %vm1164_vm5, %v3211_v28, %v1161_v24  ;;  %v1200_v44 = vsub.f32 1.5, %v1199_v11  ;;  %v1187_v15 = vmul.f32 %v3261_v37, %v3224_v16  ;;  %vm1192_vm6 = vweird.f32 %v3224_v16  ;;  %v3768_v11 = vld [vmem:[#allocation34_spill] sm:$0xff] }
 0x1cb   :  { %v650_v52 = vsub.f32 %v522_v17, %v3766_v19  ;;  %v3272_v40 = vpop.eup %1738  ;;  %v1539_v13 = vmul.f32 %v3076_v46, %v1472_v2  ;;  %v1473_v35 = vmul.f32 %v1825_v32, %v1165_v30  ;;  %v1180_v10 = vsub.f32 1.5, %v1179_v43  ;;  %v1828_v30 = vld [vmem:[#allocation2 + $0x138] sm:$0xff] }
 0x1cc   :  { %v3275_v22 = vadd.f32 1e-05, %v710_v57  ;;  %v3277_v34 = vpop.eup %1740  ;;  %v1201_v28 = vmul.f32 %v3232_v50, %v1200_v44  ;;  %v1188_v20 = vmul.f32 %v3261_v37, %v1187_v15  ;;  %vm1193_vm7 = vweird.f32 %v3261_v37 }
 0x1cd   :  { %v1227_v27 = vmul.f32 %v3272_v40, %v3226_v6  ;;  %1603 = vst [vmem:[#allocation5 + $0x118] sm:$0xff] %v1539_v13  ;;  %v1540_v5 = vmul.f32 %v3076_v46, %v1473_v35  ;;  %v1181_v1 = vmul.f32 %v3236_v9, %v1180_v10  ;;  %vm1233_vm9 = vweird.f32 %v3272_v40  ;;  %vm1194_vm12 = vmor %vm1192_vm6, %vm1193_vm7  ;;  %v1829_v35 = vld [vmem:[#allocation2 + $0x158] sm:$0xff] }
 0x1ce   :  { %v1207_v0 = vmul.f32 %v3277_v34, %v3230_v36  ;;  %v1205_v63 = vsel %vm1204_vm8, %v3232_v50, %v1201_v28  ;;  %v1189_v7 = vmul.f32 0.5, %v1188_v20  ;;  %1742 = vrsqrt.f32 %v3275_v22  ;;  %v447_v50 = vpop.xlane.xlu2 %446  ;;  %v445_v20 = vpop.xlane.xlu1 %444 }
 0x1cf   :  { %v1228_v8 = vmul.f32 %v3272_v40, %v1227_v27  ;;  %1604 = vst [vmem:[#allocation5 + $0x120] sm:$0xff] %v1540_v5  ;;  %v1477_v26 = vmul.f32 %v1826_v21, %v1205_v63  ;;  %v1185_v41 = vsel %vm1184_vm10, %v3236_v9, %v1181_v1  ;;  %vm1213_vm11 = vweird.f32 %v3277_v34  ;;  %v1830_v27 = vld [vmem:[#allocation2 + $0x148] sm:$0xff] }
 0x1d0   :  { %v1208_v25 = vmul.f32 %v3277_v34, %v1207_v0  ;;  %v1475_v29 = vmul.f32 %v1827_v18, %v1185_v41  ;;  %v1190_v14 = vsub.f32 1.5, %v1189_v7  ;;  %v714_v23 = vmax.f32 %v650_v52, 0.0  ;;  %v3769_v52 = vld [vmem:[#allocation44_spill] sm:$0xff] }
 0x1d1   :  { %v1229_v59 = vmul.f32 0.5, %v1228_v8  ;;  %v1544_v49 = vmul.f32 %v3076_v46, %v1477_v26  ;;  %v648_v4 = vsub.f32 %v520_v12, %v3767_v3  ;;  %v521_v33 = vmul.f32 0.0078125, %v439_v62  ;;  %v449_v8 = vpop.xlane.xlu0 %448 }
 0x1d2   :  { %v1209_v54 = vmul.f32 0.5, %v1208_v25  ;;  %v1542_v47 = vmul.f32 %v3076_v46, %v1475_v29  ;;  %v1191_v9 = vmul.f32 %v3261_v37, %v1190_v14  ;;  %v3307_v17 = vadd.f32 1e-05, %v714_v23  ;;  %v3771_v14 = vld [vmem:[#allocation45_spill] sm:$0xff] }
 0x1d3   :  { %v1230_v45 = vsub.f32 1.5, %v1229_v59  ;;  %1608 = vst [vmem:[#allocation5 + $0x140] sm:$0xff] %v1544_v49  ;;  %v712_v24 = vmax.f32 %v648_v4, 0.0  ;;  %v649_v55 = vsub.f32 %v521_v33, %v3768_v11  ;;  %v525_v2 = vmul.f32 0.0078125, %v447_v50  ;;  %v3773_v11 = vld [vmem:[#allocation39_spill] sm:$0xff] }
 0x1d4   :  { %v1210_v53 = vsub.f32 1.5, %v1209_v54  ;;  %v3314_v43 = vpop.eup %1742  ;;  %1606 = vst [vmem:[#allocation5 + $0x130] sm:$0xff] %v1542_v47  ;;  %v1195_v57 = vsel %vm1194_vm12, %v3261_v37, %v1191_v9  ;;  %vm1232_vm13 = vweird.f32 %v3226_v6  ;;  %1744 = vrsqrt.f32 %v3307_v17  ;;  %v3772_v47 = vld [vmem:[#allocation47_spill] sm:$0xff] }
 0x1d5   :  { %v1231_v12 = vmul.f32 %v3272_v40, %v1230_v45  ;;  %v1476_v44 = vmul.f32 %v1828_v30, %v1195_v57  ;;  %vm1234_vm14 = vmor %vm1232_vm13, %vm1233_vm9  ;;  %vm1212_vm15 = vweird.f32 %v3230_v36  ;;  %v1217_v15 = vmul.f32 %v3314_v43, %v3275_v22 }
 0x1d6   :  { %v1211_v16 = vmul.f32 %v3277_v34, %v1210_v53  ;;  %vm1214_vm0 = vmor %vm1212_vm15, %vm1213_vm11  ;;  %v3329_v6 = vadd.f32 1e-05, %v712_v24  ;;  %v713_v19 = vmax.f32 %v649_v55, 0.0  ;;  %v653_v13 = vsub.f32 %v525_v2, %v3769_v52  ;;  %v1831_v2 = vld [vmem:[#allocation2 + $0x150] sm:$0xff] }
 0x1d7   :  { %v1235_v37 = vsel %vm1234_vm14, %v3272_v40, %v1231_v12  ;;  %v1543_v32 = vmul.f32 %v3076_v46, %v1476_v44  ;;  %v1218_v36 = vmul.f32 %v3314_v43, %v1217_v15  ;;  %v3337_v40 = vmul.f32 %v3202_v51, %v3202_v51 }
 0x1d8   :  { %v1480_v10 = vmul.f32 %v1829_v35, %v1235_v37  ;;  %v1215_v28 = vsel %vm1214_vm0, %v3277_v34, %v1211_v16  ;;  %1746 = vrsqrt.f32 %v3329_v6  ;;  %v3340_v1 = vadd.f32 1e-05, %v713_v19  ;;  %v453_v34 = vpop.xlane.xlu2 %452  ;;  %v451_v19 = vpop.xlane.xlu1 %450 }
 0x1d9   :  { %v1478_v5 = vmul.f32 %v1830_v27, %v1215_v28  ;;  %1607 = vst [vmem:[#allocation5 + $0x138] sm:$0xff] %v1543_v32  ;;  %v1219_v62 = vmul.f32 0.5, %v1218_v36  ;;  %v717_v63 = vmax.f32 %v653_v13, 0.0  ;;  %v523_v7 = vmul.f32 0.0078125, %v443_v61  ;;  %v3770_v61 = vld [vmem:[#allocation22_spill] sm:$0xff] }
 0x1da   :  { %v1547_v0 = vmul.f32 %v3076_v46, %v1480_v10  ;;  %v1745_v21 = vpop.eup %1744  ;;  %v3345_v26 = vmul.f32 %v3214_v31, %v3214_v31  ;;  %1748 = vrsqrt.f32 %v3340_v1  ;;  %v524_v41 = vmul.f32 0.0078125, %v445_v20 }
 0x1db   :  { %v1545_v51 = vmul.f32 %v3076_v46, %v1478_v5  ;;  %v1220_v25 = vsub.f32 1.5, %v1219_v62  ;;  %vm1223_vm1 = vweird.f32 %v3314_v43  ;;  %v1257_v50 = vmul.f32 %v1745_v21, %v3307_v17  ;;  %v1832_v62 = vld [vmem:[#allocation2 + $0x170] sm:$0xff] }
 0x1dc   :  { %1611 = vst [vmem:[#allocation5 + $0x158] sm:$0xff] %v1547_v0  ;;  %v3351_v18 = vadd.f32 1e-05, %v717_v63  ;;  %v651_v29 = vsub.f32 %v523_v7, %v3770_v61  ;;  %v652_v59 = vsub.f32 %v524_v41, %v3771_v14  ;;  %v528_v31 = vmul.f32 0.0078125, %v453_v34  ;;  %v3774_v61 = vld [vmem:[#allocation48_spill] sm:$0xff] }
 0x1dd   :  { %1609 = vst [vmem:[#allocation5 + $0x148] sm:$0xff] %v1545_v51  ;;  %v526_v23 = vmul.f32 0.0078125, %v449_v8  ;;  %v1221_v49 = vmul.f32 %v3314_v43, %v1220_v25  ;;  %vm1222_vm2 = vweird.f32 %v3275_v22  ;;  %v1258_v54 = vmul.f32 %v1745_v21, %v1257_v50 }
 0x1de   :  { %1750 = vrsqrt.f32 %v3351_v18  ;;  %v3358_v3 = vpop.eup %1746  ;;  %vm1224_vm3 = vmor %vm1222_vm2, %vm1223_vm1  ;;  %vm1262_vm4 = vweird.f32 %v3307_v17  ;;  %v715_v4 = vmax.f32 %v651_v29, 0.0  ;;  %v716_v33 = vmax.f32 %v652_v59, 0.0 }
 0x1df   :  { %v656_v9 = vsub.f32 %v528_v31, %v3772_v47  ;;  %v1225_v45 = vsel %vm1224_vm3, %v3314_v43, %v1221_v49  ;;  %v1259_v53 = vmul.f32 0.5, %v1258_v54  ;;  %v1237_v24 = vmul.f32 %v3358_v3, %v3329_v6 }
 0x1e0   :  { %v654_v22 = vsub.f32 %v526_v23, %v3773_v11  ;;  %v3366_v55 = vpop.eup %1748  ;;  %v1479_v57 = vmul.f32 %v1831_v2, %v1225_v45  ;;  %v3368_v12 = vadd.f32 1e-05, %v715_v4  ;;  %v3370_v30 = vadd.f32 1e-05, %v716_v33  ;;  %v459_v17 = vpop.xlane.xlu2 %458 }
 0x1e1   :  { %v720_v44 = vmax.f32 %v656_v9, 0.0  ;;  %v1260_v16 = vsub.f32 1.5, %v1259_v53  ;;  %vm1263_vm5 = vweird.f32 %v1745_v21  ;;  %v1238_v15 = vmul.f32 %v3358_v3, %v1237_v24  ;;  %v1834_v24 = vld [vmem:[#allocation2 + $0x168] sm:$0xff] }
 0x1e2   :  { %v1247_v43 = vmul.f32 %v3366_v55, %v3340_v1  ;;  %v1546_v37 = vmul.f32 %v3076_v46, %v1479_v57  ;;  %vm1242_vm6 = vweird.f32 %v3329_v6  ;;  %vm1252_vm7 = vweird.f32 %v3340_v1  ;;  %vm1264_vm8 = vmor %vm1262_vm4, %vm1263_vm5  ;;  %v1833_v6 = vld [vmem:[#allocation2 + $0x160] sm:$0xff] }
 0x1e3   :  { %1752 = vrsqrt.f32 %v3368_v12  ;;  %v1261_v13 = vmul.f32 %v1745_v21, %v1260_v16  ;;  %v1239_v32 = vmul.f32 0.5, %v1238_v15  ;;  %vm1243_vm9 = vweird.f32 %v3358_v3 }
 0x1e4   :  { %v3379_v52 = vpop.eup %1750  ;;  %v1248_v35 = vmul.f32 %v3366_v55, %v1247_v43  ;;  %1754 = vrsqrt.f32 %v3370_v30  ;;  %1610 = vst [vmem:[#allocation5 + $0x150] sm:$0xff] %v1546_v37  ;;  %v3388_v28 = vadd.f32 1e-05, %v720_v44  ;;  %v718_v36 = vmax.f32 %v654_v22, 0.0  ;;  %vm1244_vm12 = vmor %vm1242_vm6, %vm1243_vm9  ;;  %v457_v44 = vpop.xlane.xlu1 %456 }
 0x1e5   :  { %v1287_v10 = vmul.f32 %v3379_v52, %v3351_v18  ;;  %v1265_v20 = vsel %vm1264_vm8, %v1745_v21, %v1261_v13  ;;  %v1240_v27 = vsub.f32 1.5, %v1239_v32  ;;  %v527_v0 = vmul.f32 0.0078125, %v451_v19  ;;  %v455_v21 = vpop.xlane.xlu0 %454  ;;  %v1835_v19 = vld [vmem:[#allocation2 + $0x188] sm:$0xff] }
 0x1e6   :  { %v1249_v5 = vmul.f32 0.5, %v1248_v35  ;;  %v1483_v63 = vmul.f32 %v1832_v62, %v1265_v20  ;;  %vm1292_vm10 = vweird.f32 %v3351_v18  ;;  %1756 = vrsqrt.f32 %v3388_v28  ;;  %v3775_v20 = vld [vmem:[#allocation46_spill] sm:$0xff] }
 0x1e7   :  { %v1288_v7 = vmul.f32 %v3379_v52, %v1287_v10  ;;  %v1241_v34 = vmul.f32 %v3358_v3, %v1240_v27  ;;  %vm1253_vm11 = vweird.f32 %v3366_v55  ;;  %v3395_v51 = vadd.f32 1e-05, %v718_v36 }
 0x1e8   :  { %v1250_v8 = vsub.f32 1.5, %v1249_v5  ;;  %v1550_v25 = vmul.f32 %v3076_v46, %v1483_v63  ;;  %vm1293_vm13 = vweird.f32 %v3379_v52  ;;  %v655_v29 = vsub.f32 %v527_v0, %v3774_v61  ;;  %vm1254_vm15 = vmor %vm1252_vm7, %vm1253_vm11  ;;  %v465_v63 = vpop.xlane.xlu2 %464 }
 0x1e9   :  { %v3397_v41 = vpop.eup %1752  ;;  %v1289_v50 = vmul.f32 0.5, %v1288_v7  ;;  %v1245_v59 = vsel %vm1244_vm12, %v3358_v3, %v1241_v34  ;;  %vm1272_vm14 = vweird.f32 %v3368_v12  ;;  %v531_v49 = vmul.f32 0.0078125, %v459_v17  ;;  %vm1294_vm1 = vmor %vm1292_vm10, %vm1293_vm13 }
 0x1ea   :  { %v3406_v14 = vpop.eup %1754  ;;  %v1251_v31 = vmul.f32 %v3366_v55, %v1250_v8  ;;  %v1267_v23 = vmul.f32 %v3397_v41, %v3368_v12  ;;  %1614 = vst [vmem:[#allocation5 + $0x170] sm:$0xff] %v1550_v25  ;;  %v1481_v54 = vmul.f32 %v1833_v6, %v1245_v59  ;;  %v529_v33 = vmul.f32 0.0078125, %v455_v21  ;;  %v1836_v25 = vld [vmem:[#allocation2 + $0x178] sm:$0xff] }
 0x1eb   :  { %v1290_v4 = vsub.f32 1.5, %v1289_v50  ;;  %v1277_v3 = vmul.f32 %v3406_v14, %v3370_v30  ;;  %vm1273_vm0 = vweird.f32 %v3397_v41  ;;  %1758 = vrsqrt.f32 %v3395_v51 }
 0x1ec   :  { %v1255_v47 = vsel %vm1254_vm15, %v3366_v55, %v1251_v31  ;;  %v1268_v9 = vmul.f32 %v3397_v41, %v1267_v23  ;;  %v3423_v45 = vpop.eup %1756  ;;  %v1548_v53 = vmul.f32 %v3076_v46, %v1481_v54  ;;  %vm1283_vm2 = vweird.f32 %v3406_v14  ;;  %vm1274_vm3 = vmor %vm1272_vm14, %vm1273_vm0  ;;  %v1837_v31 = vld [vmem:[#allocation2 + $0x180] sm:$0xff] }
 0x1ed   :  { %v1482_v1 = vmul.f32 %v1834_v24, %v1255_v47  ;;  %v1291_v11 = vmul.f32 %v3379_v52, %v1290_v4  ;;  %v1278_v22 = vmul.f32 %v3406_v14, %v1277_v3  ;;  %v1317_v2 = vmul.f32 %v3423_v45, %v3388_v28  ;;  %v461_v59 = vpop.xlane.xlu0 %460 }
 0x1ee   :  { %v1269_v55 = vmul.f32 0.5, %v1268_v9  ;;  %v719_v57 = vmax.f32 %v655_v29, 0.0  ;;  %1612 = vst [vmem:[#allocation5 + $0x160] sm:$0xff] %v1548_v53  ;;  %v659_v37 = vsub.f32 %v531_v49, %v2833_v42  ;;  %v657_v27 = vsub.f32 %v529_v33, %v3775_v20 }
 0x1ef   :  { %v1549_v16 = vmul.f32 %v3076_v46, %v1482_v1  ;;  %v1295_v15 = vsel %vm1294_vm1, %v3379_v52, %v1291_v11  ;;  %v1279_v43 = vmul.f32 0.5, %v1278_v22  ;;  %v1318_v32 = vmul.f32 %v3423_v45, %v1317_v2  ;;  %v463_v1 = vpop.xlane.xlu1 %462 }
 0x1f0   :  { %v1486_v13 = vmul.f32 %v1835_v19, %v1295_v15  ;;  %v1270_v18 = vsub.f32 1.5, %v1269_v55  ;;  %v3439_v35 = vadd.f32 1e-05, %v719_v57  ;;  %v723_v36 = vmax.f32 %v659_v37, 0.0  ;;  %v471_v37 = vpop.xlane.xlu2 %470 }
 0x1f1   :  { %1613 = vst [vmem:[#allocation5 + $0x168] sm:$0xff] %v1549_v16  ;;  %v1280_v10 = vsub.f32 1.5, %v1279_v43  ;;  %v530_v5 = vmul.f32 0.0078125, %v457_v44  ;;  %v3442_v0 = vpop.eup %1758  ;;  %v1319_v42 = vmul.f32 0.5, %v1318_v32  ;;  %vm1282_vm4 = vweird.f32 %v3370_v30  ;;  %v3776_v16 = vld [vmem:[#allocation33_spill] sm:$0xff] }
 0x1f2   :  { %v1553_v52 = vmul.f32 %v3076_v46, %v1486_v13  ;;  %v1271_v62 = vmul.f32 %v3397_v41, %v1270_v18  ;;  %1760 = vrsqrt.f32 %v3439_v35  ;;  %vm1323_vm5 = vweird.f32 %v3423_v45  ;;  %vm1284_vm6 = vmor %vm1282_vm4, %vm1283_vm2  ;;  %v1839_v13 = vld [vmem:[#allocation2 + $0x190] sm:$0xff] }
 0x1f3   :  { %v1281_v7 = vmul.f32 %v3406_v14, %v1280_v10  ;;  %v1297_v17 = vmul.f32 %v3442_v0, %v3395_v51  ;;  %v1320_v8 = vsub.f32 1.5, %v1319_v42  ;;  %v3459_v21 = vadd.f32 1e-05, %v723_v36 }
 0x1f4   :  { %1617 = vst [vmem:[#allocation5 + $0x188] sm:$0xff] %v1553_v52  ;;  %v1275_v34 = vsel %vm1274_vm3, %v3397_v41, %v1271_v62  ;;  %v721_v12 = vmax.f32 %v657_v27, 0.0  ;;  %v658_v29 = vsub.f32 %v530_v5, %v2848_v38  ;;  %vm1322_vm7 = vweird.f32 %v3388_v28  ;;  %v1838_v28 = vld [vmem:[#allocation2 + $0x1a0] sm:$0xff] }
 0x1f5   :  { %v1484_v50 = vmul.f32 %v1836_v25, %v1275_v34  ;;  %v1285_v61 = vsel %vm1284_vm6, %v3406_v14, %v1281_v7  ;;  %v1298_v30 = vmul.f32 %v3442_v0, %v1297_v17  ;;  %v1321_v41 = vmul.f32 %v3423_v45, %v1320_v8  ;;  %vm1324_vm8 = vmor %vm1322_vm7, %vm1323_vm5 }
 0x1f6   :  { %v1485_v23 = vmul.f32 %v1837_v31, %v1285_v61  ;;  %1762 = vrsqrt.f32 %v3459_v21  ;;  %v3470_v14 = vadd.f32 1e-05, %v721_v12  ;;  %v722_v54 = vmax.f32 %v658_v29, 0.0  ;;  %v1840_v29 = vld [vmem:[#allocation2 + $0x198] sm:$0xff] }
 0x1f7   :  { %v1551_v49 = vmul.f32 %v3076_v46, %v1484_v50  ;;  %v1299_v6 = vmul.f32 0.5, %v1298_v30  ;;  %v1325_v3 = vsel %vm1324_vm8, %v3423_v45, %v1321_v41  ;;  %v534_v33 = vmul.f32 0.0078125, %v465_v63 }
 0x1f8   :  { %v3472_v4 = vpop.eup %1760  ;;  %v1552_v38 = vmul.f32 %v3076_v46, %v1485_v23  ;;  %v532_v47 = vmul.f32 0.0078125, %v461_v59  ;;  %v1489_v9 = vmul.f32 %v1838_v28, %v1325_v3  ;;  %vm1303_vm9 = vweird.f32 %v3442_v0 }
 0x1f9   :  { %1615 = vst [vmem:[#allocation5 + $0x178] sm:$0xff] %v1551_v49  ;;  %v1300_v53 = vsub.f32 1.5, %v1299_v6  ;;  %v1307_v24 = vmul.f32 %v3472_v4, %v3439_v35  ;;  %vm1302_vm10 = vweird.f32 %v3395_v51  ;;  %1764 = vrsqrt.f32 %v3470_v14  ;;  %v469_v49 = vpop.xlane.xlu1 %468 }
 0x1fa   :  { %1616 = vst [vmem:[#allocation5 + $0x180] sm:$0xff] %v1552_v38  ;;  %v3481_v11 = vadd.f32 1e-05, %v722_v54  ;;  %v662_v45 = vsub.f32 %v534_v33, %v3034_v60  ;;  %v1556_v22 = vmul.f32 %v3076_v46, %v1489_v9  ;;  %v660_v57 = vsub.f32 %v532_v47, %v2829_v48  ;;  %vm1304_vm11 = vmor %vm1302_vm10, %vm1303_vm9 }
 0x1fb   :  { %v1301_v55 = vmul.f32 %v3442_v0, %v1300_v53  ;;  %v1308_v2 = vmul.f32 %v3472_v4, %v1307_v24  ;;  %v3491_v15 = vmul.f32 0.0078125, %v3776_v16  ;;  %v533_v43 = vmul.f32 0.0078125, %v463_v1 }
 0x1fc   :  { %v3488_v44 = vpop.eup %1762  ;;  %1766 = vrsqrt.f32 %v3481_v11  ;;  %v726_v51 = vmax.f32 %v662_v45, 0.0  ;;  %1620 = vst [vmem:[#allocation5 + $0x1a0] sm:$0xff] %v1556_v22  ;;  %vm1312_vm12 = vweird.f32 %v3439_v35  ;;  %v724_v10 = vmax.f32 %v660_v57, 0.0  ;;  %v3559_v45 = vld [vmem:[%s3636_s1] ss:$0 sm:$0xff]  ;;  %s1908_s1 = smov [#allocation5]  }
 0x1fd   :  { %v1305_v60 = vsel %vm1304_vm11, %v3442_v0, %v1301_v55  ;;  %v1309_v19 = vmul.f32 0.5, %v1308_v2  ;;  %v1347_v48 = vmul.f32 %v3488_v44, %v3459_v21  ;;  %v661_v36 = vsub.f32 %v533_v43, %v3173_v58  ;;  %v467_v0 = vpop.xlane.xlu0 %466  ;;  %s1636_s21 = sshll.u32 %s1908_s1, 4  ;;  %s1637_s21 = int_to_ptr.vmem [resolvable:$true] %s1636_s21 }
 0x1fe   :  { %v1487_v18 = vmul.f32 %v1839_v13, %v1305_v60  ;;  %v3498_v32 = vadd.f32 1e-05, %v726_v51  ;;  %vm1313_vm13 = vweird.f32 %v3472_v4  ;;  %v537_v5 = vmul.f32 0.0078125, %v471_v37  ;;  %v1843_v60 = vld [vmem:[#allocation2 + $0x1a8] sm:$0xff] }
 0x1ff   :  { %v1310_v20 = vsub.f32 1.5, %v1309_v19  ;;  %v1348_v27 = vmul.f32 %v3488_v44, %v1347_v48  ;;  %v3503_v52 = vpop.eup %1764  ;;  %vm1352_vm14 = vweird.f32 %v3459_v21  ;;  %v3508_v42 = vadd.f32 1e-05, %v724_v10  ;;  %vm1314_vm1 = vmor %vm1312_vm12, %vm1313_vm13 }
 0x200   :  { %v1554_v62 = vmul.f32 %v3076_v46, %v1487_v18  ;;  %1768 = vrsqrt.f32 %v3498_v32  ;;  %vm1353_vm15 = vweird.f32 %v3488_v44  ;;  %v1327_v7 = vmul.f32 %v3503_v52, %v3470_v14 }
 0x201   :  { %v1311_v63 = vmul.f32 %v3472_v4, %v1310_v20  ;;  %v1349_v58 = vmul.f32 0.5, %v1348_v27  ;;  %vm1332_vm0 = vweird.f32 %v3470_v14  ;;  %1770 = vrsqrt.f32 %v3508_v42  ;;  %vm1354_vm4 = vmor %vm1352_vm14, %vm1353_vm15 }
 0x202   :  { %v3515_v17 = vpop.eup %1766  ;;  %1618 = vst [vmem:[#allocation5 + $0x190] sm:$0xff] %v1554_v62  ;;  %v725_v34 = vmax.f32 %v661_v36, 0.0  ;;  %v665_v8 = vsub.f32 %v537_v5, %v3337_v40  ;;  %v535_v12 = vmul.f32 0.0078125, %v467_v0  ;;  %v1328_v61 = vmul.f32 %v3503_v52, %v1327_v7  ;;  %v1844_v5 = vld [vmem:[#allocation2 + $0x1b0] sm:$0xff] }
 0x203   :  { %v1315_v25 = vsel %vm1314_vm1, %v3472_v4, %v1311_v63  ;;  %v1350_v50 = vsub.f32 1.5, %v1349_v58  ;;  %v1337_v30 = vmul.f32 %v3515_v17, %v3481_v11  ;;  %vm1342_vm2 = vweird.f32 %v3481_v11  ;;  %v475_v58 = vpop.xlane.xlu1 %474 }
 0x204   :  { %v1488_v59 = vmul.f32 %v1840_v29, %v1315_v25  ;;  %v3528_v35 = vadd.f32 1e-05, %v725_v34  ;;  %v729_v31 = vmax.f32 %v665_v8, 0.0  ;;  %v1329_v41 = vmul.f32 0.5, %v1328_v61 }
 0x205   :  { %v1351_v23 = vmul.f32 %v3488_v44, %v1350_v50  ;;  %vm1333_vm3 = vweird.f32 %v3503_v52  ;;  %v1338_v40 = vmul.f32 %v3515_v17, %v1337_v30  ;;  %v663_v38 = vsub.f32 %v535_v12, %v3020_v56  ;;  %v473_v43 = vpop.xlane.xlu0 %472 }
 0x206   :  { %v3533_v6 = vpop.eup %1768  ;;  %v1555_v54 = vmul.f32 %v3076_v46, %v1488_v59  ;;  %1772 = vrsqrt.f32 %v3528_v35  ;;  %v3541_v4 = vadd.f32 1e-05, %v729_v31  ;;  %v1330_v33 = vsub.f32 1.5, %v1329_v41  ;;  %v1841_v46 = vld [vmem:[#allocation2 + $0x1b8] sm:$0xff]  ;;  %vm1334_vm7 = vmor %vm1332_vm0, %vm1333_vm3 }
 0x207   :  { %v1355_v3 = vsel %vm1354_vm4, %v3488_v44, %v1351_v23  ;;  %v1339_v47 = vmul.f32 0.5, %v1338_v40  ;;  %v1377_v28 = vmul.f32 %v3533_v6, %v3498_v32  ;;  %v3547_v9 = vpop.eup %1770  ;;  %vm1343_vm5 = vweird.f32 %v3515_v17  ;;  %v1846_v40 = vld [vmem:[#allocation2 + $0x1c0] sm:$0xff] }
 0x208   :  { %1619 = vst [vmem:[#allocation5 + $0x198] sm:$0xff] %v1555_v54  ;;  %v1492_v53 = vmul.f32 %v1841_v46, %v1355_v3  ;;  %vm1382_vm6 = vweird.f32 %v3498_v32  ;;  %1774 = vrsqrt.f32 %v3541_v4  ;;  %v1331_v56 = vmul.f32 %v3503_v52, %v1330_v33  ;;  %vm1344_vm9 = vmor %vm1342_vm2, %vm1343_vm5 }
 0x209   :  { %v1340_v21 = vsub.f32 1.5, %v1339_v47  ;;  %v1378_v24 = vmul.f32 %v3533_v6, %v1377_v28  ;;  %v1357_v1 = vmul.f32 %v3547_v9, %v3508_v42  ;;  %vm1383_vm8 = vweird.f32 %v3533_v6 }
 0x20a   :  { %v1559_v22 = vmul.f32 %v3559_v45, %v1492_v53  ;;  %v727_v55 = vmax.f32 %v663_v38, 0.0  ;;  %v536_v2 = vmul.f32 0.0078125, %v469_v49  ;;  %v1335_v57 = vsel %vm1334_vm7, %v3503_v52, %v1331_v56  ;;  %vm1384_vm11 = vmor %vm1382_vm6, %vm1383_vm8 }
 0x20b   :  { %v1341_v44 = vmul.f32 %v3515_v17, %v1340_v21  ;;  %v1379_v16 = vmul.f32 0.5, %v1378_v24  ;;  %v1358_v51 = vmul.f32 %v3547_v9, %v1357_v1  ;;  %v1490_v19 = vmul.f32 %v1843_v60, %v1335_v57 }
 0x20c   :  { %v3570_v37 = vpop.eup %1772  ;;  %1623 = vst [vmem:[#allocation5 + $0x1b8] sm:$0xff] %v1559_v22  ;;  %vm1363_vm10 = vweird.f32 %v3547_v9  ;;  %v3577_v14 = vadd.f32 1e-05, %v727_v55  ;;  %v664_v48 = vsub.f32 %v536_v2, %v3345_v26  ;;  %v538_v0 = vmul.f32 0.0078125, %v473_v43  ;;  %v1848_v55 = vld [vmem:[#allocation2 + $0x1e8] sm:$0xff] }
 0x20d   :  { %v1345_v13 = vsel %vm1344_vm9, %v3515_v17, %v1341_v44  ;;  %v1380_v18 = vsub.f32 1.5, %v1379_v16  ;;  %v1359_v10 = vmul.f32 0.5, %v1358_v51  ;;  %v1367_v36 = vmul.f32 %v3570_v37, %v3528_v35 }
 0x20e   :  { %v3583_v20 = vpop.eup %1774  ;;  %v1557_v27 = vmul.f32 %v3559_v45, %v1490_v19  ;;  %v1491_v11 = vmul.f32 %v1844_v5, %v1345_v13  ;;  %1776 = vrsqrt.f32 %v3577_v14  ;;  %v603_v7 = vmul.f32 %v3491_v15, %v3491_v15  ;;  %v1845_v15 = vld [vmem:[#allocation2 + $0x1d0] sm:$0xff] }
 0x20f   :  { %v1381_v52 = vmul.f32 %v3533_v6, %v1380_v18  ;;  %v1360_v62 = vsub.f32 1.5, %v1359_v10  ;;  %v1368_v26 = vmul.f32 %v3570_v37, %v1367_v36  ;;  %v1407_v63 = vmul.f32 %v3583_v20, %v3541_v4 }
 0x210   :  { %1621 = vst [vmem:[#allocation5 + $0x1a8] sm:$0xff] %v1557_v27  ;;  %v1558_v17 = vmul.f32 %v3559_v45, %v1491_v11  ;;  %vm1362_vm12 = vweird.f32 %v3508_v42  ;;  %v728_v34 = vmax.f32 %v664_v48, 0.0  ;;  %v666_v32 = vsub.f32 %v538_v0, %v3221_v39  ;;  %v1849_v48 = vld [vmem:[#allocation2 + $0x1d8] sm:$0xff] }
 0x211   :  { %v1385_v8 = vsel %vm1384_vm11, %v3533_v6, %v1381_v52  ;;  %v1361_v12 = vmul.f32 %v3547_v9, %v1360_v62  ;;  %v1369_v25 = vmul.f32 0.5, %v1368_v26  ;;  %v1408_v50 = vmul.f32 %v3583_v20, %v1407_v63  ;;  %vm1364_vm13 = vmor %vm1362_vm12, %vm1363_vm10  ;;  %v1850_v52 = vld [vmem:[#allocation2 + $0x1e0] sm:$0xff] }
 0x212   :  { %1622 = vst [vmem:[#allocation5 + $0x1b0] sm:$0xff] %v1558_v17  ;;  %v1495_v61 = vmul.f32 %v1845_v15, %v1385_v8  ;;  %v3604_v30 = vadd.f32 1e-05, %v728_v34  ;;  %v539_v29 = vmul.f32 0.0078125, %v475_v58  ;;  %vm1373_vm14 = vweird.f32 %v3570_v37 }
 0x213   :  { %v1365_v42 = vsel %vm1364_vm13, %v3547_v9, %v1361_v12  ;;  %v1370_v59 = vsub.f32 1.5, %v1369_v25  ;;  %v1409_v31 = vmul.f32 0.5, %v1408_v50  ;;  %vm1372_vm15 = vweird.f32 %v3528_v35  ;;  %v1847_v9 = vld [vmem:[#allocation2 + $0x1c8] sm:$0xff]  ;;  %v1851_v12 = vld [vmem:[#allocation2 + $0x1f0] sm:$0xff] }
 0x214   :  { %v1777_v23 = vpop.eup %1776  ;;  %v1562_v41 = vmul.f32 %v3559_v45, %v1495_v61  ;;  %v1493_v49 = vmul.f32 %v1846_v40, %v1365_v42  ;;  %1778 = vrsqrt.f32 %v3604_v30  ;;  %vm1413_vm0 = vweird.f32 %v3583_v20  ;;  %vm1374_vm1 = vmor %vm1372_vm15, %vm1373_vm14 }
 0x215   :  { %v1371_v6 = vmul.f32 %v3570_v37, %v1370_v59  ;;  %v1410_v54 = vsub.f32 1.5, %v1409_v31  ;;  %v1387_v39 = vmul.f32 %v1777_v23, %v3577_v14  ;;  %v730_v3 = vmax.f32 %v666_v32, 0.0 }
 0x216   :  { %1626 = vst [vmem:[#allocation5 + $0x1d0] sm:$0xff] %v1562_v41  ;;  %v1560_v38 = vmul.f32 %v3559_v45, %v1493_v49  ;;  %v667_v33 = vsub.f32 %v539_v29, %v603_v7  ;;  %vm1412_vm2 = vweird.f32 %v3541_v4  ;;  %vm1393_vm4 = vweird.f32 %v1777_v23 }
 0x217   :  { %v1375_v47 = vsel %vm1374_vm1, %v3570_v37, %v1371_v6  ;;  %v1411_v28 = vmul.f32 %v3583_v20, %v1410_v54  ;;  %v1388_v35 = vmul.f32 %v1777_v23, %v1387_v39  ;;  %vm1414_vm3 = vmor %vm1412_vm2, %vm1413_vm0  ;;  %v794_v53 = vadd.f32 1e-05, %v730_v3 }
 0x218   :  { %1624 = vst [vmem:[#allocation5 + $0x1c0] sm:$0xff] %v1560_v38  ;;  %v1494_v46 = vmul.f32 %v1847_v9, %v1375_v47  ;;  %v731_v56 = vmax.f32 %v667_v33, 0.0  ;;  %vm1392_vm5 = vweird.f32 %v3577_v14  ;;  %vm1402_vm8 = vweird.f32 %v3604_v30 }
 0x219   :  { %v1415_v21 = vsel %vm1414_vm3, %v3583_v20, %v1411_v28  ;;  %v1389_v24 = vmul.f32 0.5, %v1388_v35  ;;  %1780 = vrsqrt.f32 %v794_v53  ;;  %vm1394_vm6 = vmor %vm1392_vm5, %vm1393_vm4  ;;  %vm1422_vm11 = vweird.f32 %v794_v53 }
 0x21a   :  { %v1779_v1 = vpop.eup %1778  ;;  %v1561_v22 = vmul.f32 %v3559_v45, %v1494_v46  ;;  %v1498_v2 = vmul.f32 %v1848_v55, %v1415_v21  ;;  %v795_v44 = vadd.f32 1e-05, %v731_v56 }
 0x21b   :  { %v1390_v57 = vsub.f32 1.5, %v1389_v24  ;;  %v1397_v4 = vmul.f32 %v1779_v1, %v3604_v30  ;;  %vm1403_vm7 = vweird.f32 %v1779_v1  ;;  %v1852_v30 = vld [vmem:[#allocation2 + $0x1f8] sm:$0xff] }
 0x21c   :  { %1625 = vst [vmem:[#allocation5 + $0x1c8] sm:$0xff] %v1561_v22  ;;  %v1565_v16 = vmul.f32 %v3559_v45, %v1498_v2  ;;  %1782 = vrsqrt.f32 %v795_v44  ;;  %vm1404_vm9 = vmor %vm1402_vm8, %vm1403_vm7  ;;  %vm1432_vm14 = vweird.f32 %v795_v44 }
 0x21d   :  { %v1391_v51 = vmul.f32 %v1777_v23, %v1390_v57  ;;  %v1398_v43 = vmul.f32 %v1779_v1, %v1397_v4 }
 0x21e   :  { %1629 = vst [vmem:[#allocation5 + $0x1e8] sm:$0xff] %v1565_v16 }
 0x21f   :  { %v1395_v37 = vsel %vm1394_vm6, %v1777_v23, %v1391_v51  ;;  %v1399_v60 = vmul.f32 0.5, %v1398_v43  ;;  %v1781_v19 = vpop.eup %1780 }
 0x220   :  { %v1496_v13 = vmul.f32 %v1849_v48, %v1395_v37  ;;  %v1417_v10 = vmul.f32 %v1781_v19, %v794_v53  ;;  %vm1423_vm10 = vweird.f32 %v1781_v19 }
 0x221   :  { %v1400_v18 = vsub.f32 1.5, %v1399_v60  ;;  %vm1424_vm12 = vmor %vm1422_vm11, %vm1423_vm10 }
 0x222   :  { %v1563_v36 = vmul.f32 %v3559_v45, %v1496_v13  ;;  %v1783_v20 = vpop.eup %1782  ;;  %v1418_v5 = vmul.f32 %v1781_v19, %v1417_v10 }
 0x223   :  { %v1401_v27 = vmul.f32 %v1779_v1, %v1400_v18  ;;  %v1427_v14 = vmul.f32 %v1783_v20, %v795_v44  ;;  %vm1433_vm13 = vweird.f32 %v1783_v20 }
 0x224   :  { %1627 = vst [vmem:[#allocation5 + $0x1d8] sm:$0xff] %v1563_v36  ;;  %v1419_v0 = vmul.f32 0.5, %v1418_v5  ;;  %vm1434_vm15 = vmor %vm1432_vm14, %vm1433_vm13 }
 0x225   :  { %v1405_v11 = vsel %vm1404_vm9, %v1779_v1, %v1401_v27  ;;  %v1428_v26 = vmul.f32 %v1783_v20, %v1427_v14 }
 0x226   :  { %v1497_v62 = vmul.f32 %v1850_v52, %v1405_v11  ;;  %v1420_v63 = vsub.f32 1.5, %v1419_v0 }
 0x227   :  { %v1429_v7 = vmul.f32 0.5, %v1428_v26 }
 0x228   :  { %v1564_v58 = vmul.f32 %v3559_v45, %v1497_v62  ;;  %v1421_v17 = vmul.f32 %v1781_v19, %v1420_v63 }
 0x229   :  { %v1430_v34 = vsub.f32 1.5, %v1429_v7 }
 0x22a   :  { %1628 = vst [vmem:[#allocation5 + $0x1e0] sm:$0xff] %v1564_v58  ;;  %v1425_v8 = vsel %vm1424_vm12, %v1781_v19, %v1421_v17 }
 0x22b   :  { %v1499_v25 = vmul.f32 %v1851_v12, %v1425_v8  ;;  %v1431_v50 = vmul.f32 %v1783_v20, %v1430_v34 }
 0x22d   :  { %v1566_v15 = vmul.f32 %v3559_v45, %v1499_v25  ;;  %v1435_v61 = vsel %vm1434_vm15, %v1783_v20, %v1431_v50 }
 0x22e   :  { %v1500_v32 = vmul.f32 %v1852_v30, %v1435_v61 }
 0x22f   :  { %1630 = vst [vmem:[#allocation5 + $0x1f0] sm:$0xff] %v1566_v15 }
 0x230   :  { %v1567_v29 = vmul.f32 %v3559_v45, %v1500_v32 }
 0x232   :  { %1631 = vst [vmem:[#allocation5 + $0x1f8] sm:$0xff] %v1567_v29 }
 0x233   :  { %1644 = dma.vmem_to_hbm [thread:$0]  %s1637_s21, 8192, %s1639_s24, [#allocation4], %s1906_s14, %s1906_s14, %s1907_s15  }
 0x234   :  { %1903 = dma.done.wait [#allocation4], 8192  }
 0x235   :  { %1904 = vsyncadd [#allocation4], 4294959104 }
 0x236   :  { %1649 = vsyncpa [#allocation3], 1 }
 0x237   :  { %1650 = vsyncpa [#allocation4], 1 }

</bundles_post_ra>
